<compile_context>
chip_gen: v5e
topology: v5e:2x2
jax: 0.10.0
libtpu: 0.0.40
codegen_flags: <defaults>
</compile_context>

<pallas_src>
import functools
import math

import jax
import jax.numpy as jnp
from jax.experimental import pallas as pl
from jax.experimental.pallas import tpu as pltpu


# ---- ModelArgs constants (same as the PyTorch module) -----------------------
DIM = 768
HIDDEN_1 = 512
HIDDEN_2 = 196
CLASSES = 10

# lane-padded (multiple-of-128) versions of the lane-odd dims
HIDDEN_2_PAD = 256
CLASSES_PAD = 128


def _gelu_exact(v):
    # nn.GELU() default = exact erf formulation
    return 0.5 * v * (1.0 + jax.lax.erf(v * (1.0 / math.sqrt(2.0))))


def _round_up(n, m):
    return (n + m - 1) // m * m


def _choose_tiling(batch):
    """Return (padded_batch, batch_tile)."""
    if batch <= 256:
        bp = _round_up(batch, 8)       # single grid step: weights fetched once,
        return bp, bp                  # no per-step pipeline overhead
    bp = _round_up(batch, 256)         # 256 = v6e/v7x MXU width (also /128 v5e)
    tb = 512 if bp % 512 == 0 else 256 # >=2 steps -> both v7x TensorCores busy
    return bp, tb


def mlp_kernel(x_ref, w1_ref, b1_ref, w2_ref, b2_ref, w3_ref, b3_ref, o_ref):
    x = x_ref[...]                                                    # (TB, 768)
    h = jnp.dot(x, w1_ref[...], preferred_element_type=jnp.float32)
    h = _gelu_exact(h + b1_ref[...])                                  # (TB, 512)
    h = jnp.dot(h, w2_ref[...], preferred_element_type=jnp.float32)
    h = _gelu_exact(h + b2_ref[...])                                  # (TB, 256)
    o = jnp.dot(h, w3_ref[...], preferred_element_type=jnp.float32)
    o_ref[...] = (o + b3_ref[...]).astype(o_ref.dtype)                # (TB, 128)


@functools.partial(jax.jit, static_argnames=("use_bf16",))
def mlp_forward(x, params, *, use_bf16=False):
    """x: (B, S, D) float32. Returns (B, CLASSES) float32."""
    w1, b1, w2, b2, w3, b3 = params
    B, S, D = x.shape
    assert D == DIM

    bp, tb = _choose_tiling(B)
    grid = (bp // tb,)

    # Fused CLS-token slice: a row-major reshape is layout-preserving (free);
    # a (tb, D) block at last-dim block index 0 of (B, S*D) is exactly x[:, 0, :].
    x2d = x.reshape(B, S * D)
    if bp == B:
        inp = x2d                                    # kernel DMAs only CLS rows
    else:
        # ragged batch: slice + zero-pad the tiny (B, D) CLS matrix instead of
        # padding the whole (B, S, D) input
        inp = jnp.pad(x2d[:, :D], ((0, bp - B), (0, 0)))

    # Zero-pad lane-odd dims (exact: gelu(0) = 0 and padded w3 rows are 0).
    w2p = jnp.pad(w2, ((0, 0), (0, HIDDEN_2_PAD - HIDDEN_2)))
    b2p = jnp.pad(b2, ((0, 0), (0, HIDDEN_2_PAD - HIDDEN_2)))
    w3p = jnp.pad(w3, ((0, HIDDEN_2_PAD - HIDDEN_2), (0, CLASSES_PAD - CLASSES)))
    b3p = jnp.pad(b3, ((0, 0), (0, CLASSES_PAD - CLASSES)))

    w1p = w1
    if use_bf16:
        # opt-in: halves the dominant weight DMA, bf16 MXU path, f32 accumulate
        inp = inp.astype(jnp.bfloat16)
        w1p = w1.astype(jnp.bfloat16)

    full = lambda i: (0, 0)

    out = pl.pallas_call(
        mlp_kernel,
        out_shape=jax.ShapeDtypeStruct((bp, CLASSES_PAD), jnp.float32),
        grid_spec=pltpu.PrefetchScalarGridSpec(
            num_scalar_prefetch=0,
            grid=grid,
            in_specs=[
                pl.BlockSpec((tb, DIM), lambda i: (i, 0)),        # CLS rows of x
                pl.BlockSpec((DIM, HIDDEN_1), full),              # w1 (resident)
                pl.BlockSpec((1, HIDDEN_1), full),                # b1
                pl.BlockSpec((HIDDEN_1, HIDDEN_2_PAD), full),     # w2 (padded)
                pl.BlockSpec((1, HIDDEN_2_PAD), full),            # b2
                pl.BlockSpec((HIDDEN_2_PAD, CLASSES_PAD), full),  # w3 (padded)
                pl.BlockSpec((1, CLASSES_PAD), full),             # b3
            ],
            out_specs=pl.BlockSpec((tb, CLASSES_PAD), lambda i: (i, 0)),
        ),
        compiler_params=pltpu.CompilerParams(
            dimension_semantics=("parallel",)),
    )(inp, w1p, b1, w2p, b2p, w3p, b3p)

    return out[:B, :CLASSES]


def init_params(key):
    """Deterministic synthetic params (PyTorch Linear shapes, pre-transposed)."""
    ks = jax.random.split(key, 6)

    def linear(kw, kb, fan_in, fan_out):
        bound = 1.0 / math.sqrt(fan_in)
        w = jax.random.uniform(kw, (fan_in, fan_out), jnp.float32, -bound, bound)
        b = jax.random.uniform(kb, (1, fan_out), jnp.float32, -bound, bound)
        return w, b

    w1, b1 = linear(ks[0], ks[1], DIM, HIDDEN_1)
    w2, b2 = linear(ks[2], ks[3], HIDDEN_1, HIDDEN_2)
    w3, b3 = linear(ks[4], ks[5], HIDDEN_2, CLASSES)
    return (w1, b1, w2, b2, w3, b3)


def mlp_reference(x, params):
    w1, b1, w2, b2, w3, b3 = params
    h = x[:, 0, :]
    h = _gelu_exact(h @ w1 + b1)
    h = _gelu_exact(h @ w2 + b2)
    return h @ w3 + b3


if __name__ == "__main__":
    key = jax.random.PRNGKey(0)
    kx, kp = jax.random.split(key)
    params = init_params(kp)

    # small batch / sequence, real feature dims (multiple-of-8 batch -> fused
    # CLS-slice path, single grid step)
    B, S = 16, 8
    x = jax.random.normal(kx, (B, S, DIM), jnp.float32)
    out = jax.block_until_ready(mlp_forward(x, params))
    ref = mlp_reference(x, params)
    assert out.shape == (B, CLASSES)
    assert jnp.allclose(out, ref, atol=1e-4, rtol=1e-4)

    # ragged batch -> exercises the pad-to-multiple-of-8 fallback path
    B2 = 6
    x2 = jax.random.normal(kx, (B2, S, DIM), jnp.float32)
    out2 = jax.block_until_ready(mlp_forward(x2, params))
    ref2 = mlp_reference(x2, params)
    assert out2.shape == (B2, CLASSES)
    assert jnp.allclose(out2, ref2, atol=1e-4, rtol=1e-4)

    print("KERNEL_OK")
</pallas_src>

<mosaic_0001>
module attributes {stable_mosaic.version = 11 : i64} {
  func.func @mlp_kernel(%arg0: i32, %arg1: memref<16x768xf32, #tpu.memory_space<vmem>>, %arg2: memref<768x512xf32, #tpu.memory_space<vmem>>, %arg3: memref<1x512xf32, #tpu.memory_space<vmem>>, %arg4: memref<512x256xf32, #tpu.memory_space<vmem>>, %arg5: memref<1x256xf32, #tpu.memory_space<vmem>>, %arg6: memref<256x128xf32, #tpu.memory_space<vmem>>, %arg7: memref<1x128xf32, #tpu.memory_space<vmem>>, %arg8: memref<16x128xf32, #tpu.memory_space<vmem>>) attributes {dimension_semantics = [#tpu.dimension_semantics<parallel>], iteration_bounds = array<i64: 1>, scalar_prefetch = 0 : i64, scratch_operands = 0 : i64, tpu.core_type = #tpu.core_type<tc>, window_params = [{transform_indices = @transform_0, window_bounds = array<i64: 16, 768>}, {pipeline_mode = #tpu.pipeline_mode<synchronous>, transform_indices = @transform_1, window_bounds = array<i64: 768, 512>}, {pipeline_mode = #tpu.pipeline_mode<synchronous>, transform_indices = @transform_2, window_bounds = array<i64: 1, 512>}, {pipeline_mode = #tpu.pipeline_mode<synchronous>, transform_indices = @transform_3, window_bounds = array<i64: 512, 256>}, {pipeline_mode = #tpu.pipeline_mode<synchronous>, transform_indices = @transform_4, window_bounds = array<i64: 1, 256>}, {pipeline_mode = #tpu.pipeline_mode<synchronous>, transform_indices = @transform_5, window_bounds = array<i64: 256, 128>}, {pipeline_mode = #tpu.pipeline_mode<synchronous>, transform_indices = @transform_6, window_bounds = array<i64: 1, 128>}, {transform_indices = @transform_7, window_bounds = array<i64: 16, 128>}]} {
    %c0 = arith.constant 0 : index
    %c0_0 = arith.constant 0 : index
    %0 = vector.load %arg1[%c0, %c0_0] : memref<16x768xf32, #tpu.memory_space<vmem>>, vector<16x768xf32>
    %c0_1 = arith.constant 0 : index
    %c0_2 = arith.constant 0 : index
    %1 = vector.load %arg2[%c0_1, %c0_2] : memref<768x512xf32, #tpu.memory_space<vmem>>, vector<768x512xf32>
    %cst = arith.constant dense<0.000000e+00> : vector<16x512xf32>
    %2 = tpu.matmul %0, %1, %cst {dimension_numbers = #tpu.dot_dimension_numbers<[1], [0], [0], [1], [0, 0, 1, 1], [], []>} : vector<16x768xf32>, vector<768x512xf32>, vector<16x512xf32> -> vector<16x512xf32>
    %c0_3 = arith.constant 0 : index
    %c0_4 = arith.constant 0 : index
    %3 = vector.load %arg3[%c0_3, %c0_4] : memref<1x512xf32, #tpu.memory_space<vmem>>, vector<1x512xf32>
    %4 = vector.broadcast %3 : vector<1x512xf32> to vector<16x512xf32>
    %5 = arith.addf %2, %4 : vector<16x512xf32>
    %cst_5 = arith.constant 5.000000e-01 : f32
    %6 = vector.broadcast %cst_5 : f32 to vector<16x512xf32>
    %7 = arith.mulf %6, %5 : vector<16x512xf32>
    %cst_6 = arith.constant 0.707106769 : f32
    %8 = vector.broadcast %cst_6 : f32 to vector<16x512xf32>
    %9 = arith.mulf %5, %8 : vector<16x512xf32>
    %10 = math.erf %9 : vector<16x512xf32>
    %cst_7 = arith.constant 1.000000e+00 : f32
    %11 = vector.broadcast %cst_7 : f32 to vector<16x512xf32>
    %12 = arith.addf %11, %10 : vector<16x512xf32>
    %13 = arith.mulf %7, %12 : vector<16x512xf32>
    %c0_8 = arith.constant 0 : index
    %c0_9 = arith.constant 0 : index
    %14 = vector.load %arg4[%c0_8, %c0_9] : memref<512x256xf32, #tpu.memory_space<vmem>>, vector<512x256xf32>
    %cst_10 = arith.constant dense<0.000000e+00> : vector<16x256xf32>
    %15 = tpu.matmul %13, %14, %cst_10 {dimension_numbers = #tpu.dot_dimension_numbers<[1], [0], [0], [1], [0, 0, 1, 1], [], []>} : vector<16x512xf32>, vector<512x256xf32>, vector<16x256xf32> -> vector<16x256xf32>
    %c0_11 = arith.constant 0 : index
    %c0_12 = arith.constant 0 : index
    %16 = vector.load %arg5[%c0_11, %c0_12] : memref<1x256xf32, #tpu.memory_space<vmem>>, vector<1x256xf32>
    %17 = vector.broadcast %16 : vector<1x256xf32> to vector<16x256xf32>
    %18 = arith.addf %15, %17 : vector<16x256xf32>
    %cst_13 = arith.constant 5.000000e-01 : f32
    %19 = vector.broadcast %cst_13 : f32 to vector<16x256xf32>
    %20 = arith.mulf %19, %18 : vector<16x256xf32>
    %cst_14 = arith.constant 0.707106769 : f32
    %21 = vector.broadcast %cst_14 : f32 to vector<16x256xf32>
    %22 = arith.mulf %18, %21 : vector<16x256xf32>
    %23 = math.erf %22 : vector<16x256xf32>
    %cst_15 = arith.constant 1.000000e+00 : f32
    %24 = vector.broadcast %cst_15 : f32 to vector<16x256xf32>
    %25 = arith.addf %24, %23 : vector<16x256xf32>
    %26 = arith.mulf %20, %25 : vector<16x256xf32>
    %c0_16 = arith.constant 0 : index
    %c0_17 = arith.constant 0 : index
    %27 = vector.load %arg6[%c0_16, %c0_17] : memref<256x128xf32, #tpu.memory_space<vmem>>, vector<256x128xf32>
    %cst_18 = arith.constant dense<0.000000e+00> : vector<16x128xf32>
    %28 = tpu.matmul %26, %27, %cst_18 {dimension_numbers = #tpu.dot_dimension_numbers<[1], [0], [0], [1], [0, 0, 1, 1], [], []>} : vector<16x256xf32>, vector<256x128xf32>, vector<16x128xf32> -> vector<16x128xf32>
    %c0_19 = arith.constant 0 : index
    %c0_20 = arith.constant 0 : index
    %29 = vector.load %arg7[%c0_19, %c0_20] : memref<1x128xf32, #tpu.memory_space<vmem>>, vector<1x128xf32>
    %30 = vector.broadcast %29 : vector<1x128xf32> to vector<16x128xf32>
    %31 = arith.addf %28, %30 : vector<16x128xf32>
    %c0_21 = arith.constant 0 : index
    %c0_22 = arith.constant 0 : index
    %32 = vector.load %arg8[%c0_21, %c0_22] : memref<16x128xf32, #tpu.memory_space<vmem>>, vector<16x128xf32>
    tpu.vector_store %arg8[%c0_21, %c0_22], %31 {strides = array<i32>} : memref<16x128xf32, #tpu.memory_space<vmem>>, vector<16x128xf32>,
    return
  }
  func.func @transform_0(%arg0: i32) -> (i32, i32) {
    %c0_i32 = arith.constant 0 : i32
    %c0_i32_0 = arith.constant 0 : i32
    return %arg0, %c0_i32 : i32, i32
  }
  func.func @transform_1(%arg0: i32) -> (i32, i32) {
    %c0_i32 = arith.constant 0 : i32
    %c0_i32_0 = arith.constant 0 : i32
    %c0_i32_1 = arith.constant 0 : i32
    return %c0_i32, %c0_i32_0 : i32, i32
  }
  func.func @transform_2(%arg0: i32) -> (i32, i32) {
    %c0_i32 = arith.constant 0 : i32
    %c0_i32_0 = arith.constant 0 : i32
    %c0_i32_1 = arith.constant 0 : i32
    return %c0_i32, %c0_i32_0 : i32, i32
  }
  func.func @transform_3(%arg0: i32) -> (i32, i32) {
    %c0_i32 = arith.constant 0 : i32
    %c0_i32_0 = arith.constant 0 : i32
    %c0_i32_1 = arith.constant 0 : i32
    return %c0_i32, %c0_i32_0 : i32, i32
  }
  func.func @transform_4(%arg0: i32) -> (i32, i32) {
    %c0_i32 = arith.constant 0 : i32
    %c0_i32_0 = arith.constant 0 : i32
    %c0_i32_1 = arith.constant 0 : i32
    return %c0_i32, %c0_i32_0 : i32, i32
  }
  func.func @transform_5(%arg0: i32) -> (i32, i32) {
    %c0_i32 = arith.constant 0 : i32
    %c0_i32_0 = arith.constant 0 : i32
    %c0_i32_1 = arith.constant 0 : i32
    return %c0_i32, %c0_i32_0 : i32, i32
  }
  func.func @transform_6(%arg0: i32) -> (i32, i32) {
    %c0_i32 = arith.constant 0 : i32
    %c0_i32_0 = arith.constant 0 : i32
    %c0_i32_1 = arith.constant 0 : i32
    return %c0_i32, %c0_i32_0 : i32, i32
  }
  func.func @transform_7(%arg0: i32) -> (i32, i32) {
    %c0_i32 = arith.constant 0 : i32
    %c0_i32_0 = arith.constant 0 : i32
    return %arg0, %c0_i32 : i32, i32
  }
}

</mosaic_0001>

<bundles_post_ra>
// kernel: mlp_forward.1
= control target key start
LH: loop header
LB: loop body
LE: loop exit
PB: predicated region body
PF: predicated region fallthrough
CT: control target
= control target key end

     0   :  { %s4246_s0 = inlined_call_operand.vmem [shape: f32[16,6144], index: 0, kind: input, shape index: {}]   ;;  %s4247_s1 = inlined_call_operand.vmem [shape: f32[768,512], index: 1, kind: input, shape index: {}]   ;;  %s4248_s2 = inlined_call_operand.vmem [shape: f32[1,512], index: 2, kind: input, shape index: {}]   ;;  %s4249_s3 = inlined_call_operand.vmem [shape: f32[512,256], index: 3, kind: input, shape index: {}]   ;;  %s4250_s4 = inlined_call_operand.vmem [shape: f32[1,256], index: 4, kind: input, shape index: {}]   ;;  %s4251_s5 = inlined_call_operand.vmem [shape: f32[256,128], index: 5, kind: input, shape index: {}]   ;;  %s4252_s6 = inlined_call_operand.vmem [shape: f32[1,128], index: 6, kind: input, shape index: {}]   ;;  %s4253_s7 = inlined_call_operand.hbm [shape: f32[16,128], index: 7, kind: output, shape index: {}]  }
   0x1   :  { %v140_v0 = vld [vmem:[%s4247_s1 + $0x1e0] sm:$0xff]  ;;  %v141_v63 = vld [vmem:[%s4247_s1 + $0x1e8] sm:$0xff] }
   0x2   :  { %v268_v1 = vld [vmem:[%s4247_s1 + $0x5e0] sm:$0xff]  ;;  %474 = vmatpush.msra.mxu0 %v140_v0 }
   0x3   :  { %v136_v2 = vld [vmem:[%s4247_s1 + $0x1c0] sm:$0xff]  ;;  %520 = vmatpush.msra.mxu2 %v268_v1 }
   0x4   :  { %v204_v3 = vld [vmem:[%s4247_s1 + $0x3e0] sm:$0xff]  ;;  %475 = vmatpush.msra.mxu0 %v136_v2 }
   0x5   :  { %v264_v4 = vld [vmem:[%s4247_s1 + $0x5c0] sm:$0xff]  ;;  %497 = vmatpush.msra.mxu1 %v204_v3 }
   0x6   :  { %v332_v5 = vld [vmem:[%s4247_s1 + $0x7e0] sm:$0xff]  ;;  %521 = vmatpush.msra.mxu2 %v264_v4  ;;  %v137_v4 = vld [vmem:[%s4247_s1 + $0x1c8] sm:$0xff] }
   0x7   :  { %543 = vmatpush.msra.mxu3 %v332_v5  ;;  %v132_v6 = vld [vmem:[%s4247_s1 + $0x1a0] sm:$0xff]  ;;  %v205_v5 = vld [vmem:[%s4247_s1 + $0x3e8] sm:$0xff] }
   0x8   :  { %v200_v7 = vld [vmem:[%s4247_s1 + $0x3c0] sm:$0xff]  ;;  %476 = vmatpush.msra.mxu0 %v132_v6 }
   0x9   :  { %v260_v8 = vld [vmem:[%s4247_s1 + $0x5a0] sm:$0xff]  ;;  %498 = vmatpush.msra.mxu1 %v200_v7 }
   0xa   :  { %v328_v9 = vld [vmem:[%s4247_s1 + $0x7c0] sm:$0xff]  ;;  %522 = vmatpush.msra.mxu2 %v260_v8  ;;  %v133_v8 = vld [vmem:[%s4247_s1 + $0x1a8] sm:$0xff] }
   0xb   :  { %v196_v10 = vld [vmem:[%s4247_s1 + $0x3a0] sm:$0xff]  ;;  %544 = vmatpush.msra.mxu3 %v328_v9  ;;  %v201_v9 = vld [vmem:[%s4247_s1 + $0x3c8] sm:$0xff] }
   0xc   :  { %v128_v11 = vld [vmem:[%s4247_s1 + $0x180] sm:$0xff]  ;;  %499 = vmatpush.msra.mxu1 %v196_v10 }
   0xd   :  { %v256_v12 = vld [vmem:[%s4247_s1 + $0x580] sm:$0xff]  ;;  %477 = vmatpush.msra.mxu0 %v128_v11 }
   0xe   :  { %v324_v13 = vld [vmem:[%s4247_s1 + $0x7a0] sm:$0xff]  ;;  %523 = vmatpush.msra.mxu2 %v256_v12  ;;  %v129_v12 = vld [vmem:[%s4247_s1 + $0x188] sm:$0xff] }
   0xf   :  { %v192_v14 = vld [vmem:[%s4247_s1 + $0x380] sm:$0xff]  ;;  %545 = vmatpush.msra.mxu3 %v324_v13  ;;  %v197_v13 = vld [vmem:[%s4247_s1 + $0x3a8] sm:$0xff] }
  0x10   :  { %v320_v15 = vld [vmem:[%s4247_s1 + $0x780] sm:$0xff]  ;;  %500 = vmatpush.msra.mxu1 %v192_v14 }
  0x11   :  { %v124_v16 = vld [vmem:[%s4247_s1 + $0x160] sm:$0xff]  ;;  %546 = vmatpush.msra.mxu3 %v320_v15 }
  0x12   :  { %v252_v17 = vld [vmem:[%s4247_s1 + $0x560] sm:$0xff]  ;;  %478 = vmatpush.msra.mxu0 %v124_v16  ;;  %v125_v16 = vld [vmem:[%s4247_s1 + $0x168] sm:$0xff] }
  0x13   :  { %v188_v18 = vld [vmem:[%s4247_s1 + $0x360] sm:$0xff]  ;;  %524 = vmatpush.msra.mxu2 %v252_v17  ;;  %v193_v17 = vld [vmem:[%s4247_s1 + $0x388] sm:$0xff] }
  0x14   :  { %v316_v19 = vld [vmem:[%s4247_s1 + $0x760] sm:$0xff]  ;;  %501 = vmatpush.msra.mxu1 %v188_v18 }
  0x15   :  { %v120_v20 = vld [vmem:[%s4247_s1 + $0x140] sm:$0xff]  ;;  %547 = vmatpush.msra.mxu3 %v316_v19 }
  0x16   :  { %v248_v21 = vld [vmem:[%s4247_s1 + $0x540] sm:$0xff]  ;;  %479 = vmatpush.msra.mxu0 %v120_v20  ;;  %v121_v20 = vld [vmem:[%s4247_s1 + $0x148] sm:$0xff] }
  0x17   :  { %v184_v22 = vld [vmem:[%s4247_s1 + $0x340] sm:$0xff]  ;;  %525 = vmatpush.msra.mxu2 %v248_v21  ;;  %v189_v21 = vld [vmem:[%s4247_s1 + $0x368] sm:$0xff] }
  0x18   :  { %v312_v23 = vld [vmem:[%s4247_s1 + $0x740] sm:$0xff]  ;;  %502 = vmatpush.msra.mxu1 %v184_v22 }
  0x19   :  { %v116_v24 = vld [vmem:[%s4247_s1 + $0x120] sm:$0xff]  ;;  %548 = vmatpush.msra.mxu3 %v312_v23 }
  0x1a   :  { %v244_v25 = vld [vmem:[%s4247_s1 + $0x520] sm:$0xff]  ;;  %480 = vmatpush.msra.mxu0 %v116_v24  ;;  %v117_v24 = vld [vmem:[%s4247_s1 + $0x128] sm:$0xff] }
  0x1b   :  { %v180_v26 = vld [vmem:[%s4247_s1 + $0x320] sm:$0xff]  ;;  %526 = vmatpush.msra.mxu2 %v244_v25  ;;  %v185_v25 = vld [vmem:[%s4247_s1 + $0x348] sm:$0xff] }
  0x1c   :  { %v308_v27 = vld [vmem:[%s4247_s1 + $0x720] sm:$0xff]  ;;  %503 = vmatpush.msra.mxu1 %v180_v26 }
  0x1d   :  { %v112_v28 = vld [vmem:[%s4247_s1 + $0x100] sm:$0xff]  ;;  %549 = vmatpush.msra.mxu3 %v308_v27 }
  0x1e   :  { %v240_v29 = vld [vmem:[%s4247_s1 + $0x500] sm:$0xff]  ;;  %481 = vmatpush.msra.mxu0 %v112_v28  ;;  %v113_v28 = vld [vmem:[%s4247_s1 + $0x108] sm:$0xff] }
  0x1f   :  { %v176_v30 = vld [vmem:[%s4247_s1 + $0x300] sm:$0xff]  ;;  %527 = vmatpush.msra.mxu2 %v240_v29  ;;  %v181_v29 = vld [vmem:[%s4247_s1 + $0x328] sm:$0xff] }
  0x20   :  { %v304_v31 = vld [vmem:[%s4247_s1 + $0x700] sm:$0xff]  ;;  %504 = vmatpush.msra.mxu1 %v176_v30 }
  0x21   :  { %v108_v32 = vld [vmem:[%s4247_s1 + $0xe0] sm:$0xff]  ;;  %550 = vmatpush.msra.mxu3 %v304_v31 }
  0x22   :  { %v236_v33 = vld [vmem:[%s4247_s1 + $0x4e0] sm:$0xff]  ;;  %482 = vmatpush.msra.mxu0 %v108_v32 }
  0x23   :  { %v172_v34 = vld [vmem:[%s4247_s1 + $0x2e0] sm:$0xff]  ;;  %528 = vmatpush.msra.mxu2 %v236_v33  ;;  %v109_v33 = vld [vmem:[%s4247_s1 + $0xe8] sm:$0xff] }
  0x24   :  { %v300_v35 = vld [vmem:[%s4247_s1 + $0x6e0] sm:$0xff]  ;;  %505 = vmatpush.msra.mxu1 %v172_v34  ;;  %v177_v34 = vld [vmem:[%s4247_s1 + $0x308] sm:$0xff] }
  0x25   :  { %v104_v36 = vld [vmem:[%s4247_s1 + $0xc0] sm:$0xff]  ;;  %551 = vmatpush.msra.mxu3 %v300_v35  ;;  %v2434_v35 = vld [vmem:[%s4246_s0 + $0x8] sm:$0xff] }
  0x26   :  { %v232_v37 = vld [vmem:[%s4247_s1 + $0x4c0] sm:$0xff]  ;;  %483 = vmatpush.msra.mxu0 %v104_v36 }
  0x27   :  { %v168_v38 = vld [vmem:[%s4247_s1 + $0x2c0] sm:$0xff]  ;;  %529 = vmatpush.msra.mxu2 %v232_v37 }
  0x28   :  { %v296_v39 = vld [vmem:[%s4247_s1 + $0x6c0] sm:$0xff]  ;;  %506 = vmatpush.msra.mxu1 %v168_v38  ;;  %v105_v38 = vld [vmem:[%s4247_s1 + $0xc8] sm:$0xff] }
  0x29   :  { %v100_v40 = vld [vmem:[%s4247_s1 + $0xa0] sm:$0xff]  ;;  %552 = vmatpush.msra.mxu3 %v296_v39  ;;  %v173_v39 = vld [vmem:[%s4247_s1 + $0x2e8] sm:$0xff] }
  0x2a   :  { %v228_v41 = vld [vmem:[%s4247_s1 + $0x4a0] sm:$0xff]  ;;  %484 = vmatpush.msra.mxu0 %v100_v40 }
  0x2b   :  { %v164_v42 = vld [vmem:[%s4247_s1 + $0x2a0] sm:$0xff]  ;;  %530 = vmatpush.msra.mxu2 %v228_v41 }
  0x2c   :  { %v292_v43 = vld [vmem:[%s4247_s1 + $0x6a0] sm:$0xff]  ;;  %507 = vmatpush.msra.mxu1 %v164_v42  ;;  %v101_v42 = vld [vmem:[%s4247_s1 + $0xa8] sm:$0xff] }
  0x2d   :  { %v96_v44 = vld [vmem:[%s4247_s1 + $0x80] sm:$0xff]  ;;  %553 = vmatpush.msra.mxu3 %v292_v43  ;;  %v169_v43 = vld [vmem:[%s4247_s1 + $0x2c8] sm:$0xff] }
  0x2e   :  { %v224_v45 = vld [vmem:[%s4247_s1 + $0x480] sm:$0xff]  ;;  %485 = vmatpush.msra.mxu0 %v96_v44  ;;  %v2465_v44 = vld [vmem:[%s4246_s0 + $0x10] sm:$0xff] }
  0x2f   :  { %v160_v46 = vld [vmem:[%s4247_s1 + $0x280] sm:$0xff]  ;;  %531 = vmatpush.msra.mxu2 %v224_v45 }
  0x30   :  { %v288_v47 = vld [vmem:[%s4247_s1 + $0x680] sm:$0xff]  ;;  %508 = vmatpush.msra.mxu1 %v160_v46 }
  0x31   :  { %v92_v48 = vld [vmem:[%s4247_s1 + $0x60] sm:$0xff]  ;;  %554 = vmatpush.msra.mxu3 %v288_v47  ;;  %v97_v47 = vld [vmem:[%s4247_s1 + $0x88] sm:$0xff] }
  0x32   :  { %v220_v49 = vld [vmem:[%s4247_s1 + $0x460] sm:$0xff]  ;;  %486 = vmatpush.msra.mxu0 %v92_v48  ;;  %v165_v48 = vld [vmem:[%s4247_s1 + $0x2a8] sm:$0xff] }
  0x33   :  { %v156_v50 = vld [vmem:[%s4247_s1 + $0x260] sm:$0xff]  ;;  %532 = vmatpush.msra.mxu2 %v220_v49 }
  0x34   :  { %v284_v51 = vld [vmem:[%s4247_s1 + $0x660] sm:$0xff]  ;;  %509 = vmatpush.msra.mxu1 %v156_v50  ;;  %v2488_v50 = vld [vmem:[%s4246_s0 + $0x18] sm:$0xff] }
  0x35   :  { %v88_v52 = vld [vmem:[%s4247_s1 + $0x40] sm:$0xff]  ;;  %555 = vmatpush.msra.mxu3 %v284_v51 }
  0x36   :  { %v216_v53 = vld [vmem:[%s4247_s1 + $0x440] sm:$0xff]  ;;  %487 = vmatpush.msra.mxu0 %v88_v52 }
  0x37   :  { %v152_v54 = vld [vmem:[%s4247_s1 + $0x240] sm:$0xff]  ;;  %533 = vmatpush.msra.mxu2 %v216_v53  ;;  %v93_v53 = vld [vmem:[%s4247_s1 + $0x68] sm:$0xff] }
  0x38   :  { %v280_v55 = vld [vmem:[%s4247_s1 + $0x640] sm:$0xff]  ;;  %510 = vmatpush.msra.mxu1 %v152_v54  ;;  %v161_v54 = vld [vmem:[%s4247_s1 + $0x288] sm:$0xff] }
  0x39   :  { %v84_v56 = vld [vmem:[%s4247_s1 + $0x20] sm:$0xff]  ;;  %556 = vmatpush.msra.mxu3 %v280_v55  ;;  %v2506_v55 = vld [vmem:[%s4246_s0 + $0x188] sm:$0xff] }
  0x3a   :  { %v212_v57 = vld [vmem:[%s4247_s1 + $0x420] sm:$0xff]  ;;  %488 = vmatpush.msra.mxu0 %v84_v56 }
  0x3b   :  { %v148_v58 = vld [vmem:[%s4247_s1 + $0x220] sm:$0xff]  ;;  %534 = vmatpush.msra.mxu2 %v212_v57 }
  0x3c   :  { %v276_v59 = vld [vmem:[%s4247_s1 + $0x620] sm:$0xff]  ;;  %511 = vmatpush.msra.mxu1 %v148_v58  ;;  %v89_v58 = vld [vmem:[%s4247_s1 + $0x48] sm:$0xff] }
  0x3d   :  { %v80_v60 = vld [vmem:[%s4247_s1] sm:$0xff]  ;;  %557 = vmatpush.msra.mxu3 %v276_v59  ;;  %v157_v59 = vld [vmem:[%s4247_s1 + $0x268] sm:$0xff] }
  0x3e   :  { %v208_v61 = vld [vmem:[%s4247_s1 + $0x400] sm:$0xff]  ;;  %489 = vmatpush.msra.mxu0 %v80_v60 }
  0x3f   :  { %v396_v62 = vld [vmem:[%s4247_s1 + $0x9e0] sm:$0xff]  ;;  %535 = vmatpush.msra.mxu2 %v208_v61 }
  0x40   :  { %v144_v0 = vld [vmem:[%s4247_s1 + $0x200] sm:$0xff]  ;;  %566 = vmatpush.msrb.mxu0 %v396_v62  ;;  %536 = vmatmul.f32.vlgmr.msra.gmra.mxu2 %v2465_v44  ;;  %v85_v62 = vld [vmem:[%s4247_s1 + $0x28] sm:$0xff] }
  0x41   :  { %v272_v1 = vld [vmem:[%s4247_s1 + $0x600] sm:$0xff]  ;;  %612 = vmatpush.msrb.mxu2 %v141_v63  ;;  %512 = vmatpush.msra.mxu1 %v144_v0  ;;  %v153_v63 = vld [vmem:[%s4247_s1 + $0x248] sm:$0xff]  ;;  %v2537_v0 = vld [vmem:[%s4246_s0 + $0x190] sm:$0xff] }
  0x42   :  { %v392_v2 = vld [vmem:[%s4247_s1 + $0x9c0] sm:$0xff]  ;;  %558 = vmatpush.msra.mxu3 %v272_v1  ;;  %513 = vmatmul.f32.vlgmr.msra.gmra.mxu1 %v2434_v35 }
  0x43   :  { %v460_v3 = vld [vmem:[%s4247_s1 + $0xbe0] sm:$0xff]  ;;  %567 = vmatpush.msrb.mxu0 %v392_v2  ;;  %613 = vmatpush.msrb.mxu2 %v137_v4 }
  0x44   :  { %v388_v6 = vld [vmem:[%s4247_s1 + $0x9a0] sm:$0xff]  ;;  %589 = vmatpush.msrb.mxu1 %v460_v3  ;;  %635 = vmatpush.msrb.mxu3 %v205_v5 }
  0x45   :  { %v456_v7 = vld [vmem:[%s4247_s1 + $0xbc0] sm:$0xff]  ;;  %568 = vmatpush.msrb.mxu0 %v388_v6  ;;  %614 = vmatpush.msrb.mxu2 %v133_v8 }
  0x46   :  { %v384_v10 = vld [vmem:[%s4247_s1 + $0x980] sm:$0xff]  ;;  %590 = vmatpush.msrb.mxu1 %v456_v7  ;;  %636 = vmatpush.msrb.mxu3 %v201_v9 }
  0x47   :  { %v452_v11 = vld [vmem:[%s4247_s1 + $0xba0] sm:$0xff]  ;;  %569 = vmatpush.msrb.mxu0 %v384_v10  ;;  %615 = vmatpush.msrb.mxu2 %v129_v12 }
  0x48   :  { %v380_v14 = vld [vmem:[%s4247_s1 + $0x960] sm:$0xff]  ;;  %591 = vmatpush.msrb.mxu1 %v452_v11  ;;  %637 = vmatpush.msrb.mxu3 %v197_v13 }
  0x49   :  { %v448_v15 = vld [vmem:[%s4247_s1 + $0xb80] sm:$0xff]  ;;  %570 = vmatpush.msrb.mxu0 %v380_v14  ;;  %616 = vmatpush.msrb.mxu2 %v125_v16 }
  0x4a   :  { %v376_v18 = vld [vmem:[%s4247_s1 + $0x940] sm:$0xff]  ;;  %592 = vmatpush.msrb.mxu1 %v448_v15  ;;  %638 = vmatpush.msrb.mxu3 %v193_v17 }
  0x4b   :  { %v444_v19 = vld [vmem:[%s4247_s1 + $0xb60] sm:$0xff]  ;;  %571 = vmatpush.msrb.mxu0 %v376_v18  ;;  %617 = vmatpush.msrb.mxu2 %v121_v20 }
  0x4c   :  { %v372_v22 = vld [vmem:[%s4247_s1 + $0x920] sm:$0xff]  ;;  %593 = vmatpush.msrb.mxu1 %v444_v19  ;;  %639 = vmatpush.msrb.mxu3 %v189_v21 }
  0x4d   :  { %v440_v23 = vld [vmem:[%s4247_s1 + $0xb40] sm:$0xff]  ;;  %572 = vmatpush.msrb.mxu0 %v372_v22  ;;  %618 = vmatpush.msrb.mxu2 %v117_v24 }
  0x4e   :  { %v368_v26 = vld [vmem:[%s4247_s1 + $0x900] sm:$0xff]  ;;  %594 = vmatpush.msrb.mxu1 %v440_v23  ;;  %640 = vmatpush.msrb.mxu3 %v185_v25 }
  0x4f   :  { %v436_v27 = vld [vmem:[%s4247_s1 + $0xb20] sm:$0xff]  ;;  %573 = vmatpush.msrb.mxu0 %v368_v26  ;;  %619 = vmatpush.msrb.mxu2 %v113_v28 }
  0x50   :  { %v2417_v30 = vld [vmem:[%s4246_s0] sm:$0xff]  ;;  %595 = vmatpush.msrb.mxu1 %v436_v27  ;;  %641 = vmatpush.msrb.mxu3 %v181_v29 }
  0x51   :  { %v432_v31 = vld [vmem:[%s4247_s1 + $0xb00] sm:$0xff]  ;;  %490 = vmatmul.f32.vlgmr.msra.gmra.mxu0 %v2417_v30  ;;  %620 = vmatpush.msrb.mxu2 %v109_v33 }
  0x52   :  { %v364_v32 = vld [vmem:[%s4247_s1 + $0x8e0] sm:$0xff]  ;;  %596 = vmatpush.msrb.mxu1 %v432_v31  ;;  %642 = vmatpush.msrb.mxu3 %v177_v34 }
  0x53   :  { %v360_v36 = vld [vmem:[%s4247_s1 + $0x8c0] sm:$0xff]  ;;  %574 = vmatpush.msrb.mxu0 %v364_v32  ;;  %621 = vmatpush.msrb.mxu2 %v105_v38 }
  0x54   :  { %v428_v37 = vld [vmem:[%s4247_s1 + $0xae0] sm:$0xff]  ;;  %643 = vmatpush.msrb.mxu3 %v173_v39  ;;  %516 = vmatmul.f32.gmra.mxu1 %v2506_v55 }
  0x55   :  { %v356_v40 = vld [vmem:[%s4247_s1 + $0x8a0] sm:$0xff]  ;;  %575 = vmatpush.msrb.mxu0 %v360_v36  ;;  %597 = vmatpush.msrb.mxu1 %v428_v37 }
  0x56   :  { %v424_v41 = vld [vmem:[%s4247_s1 + $0xac0] sm:$0xff]  ;;  %622 = vmatpush.msrb.mxu2 %v101_v42  ;;  %644 = vmatpush.msrb.mxu3 %v169_v43 }
  0x57   :  { %v352_v45 = vld [vmem:[%s4247_s1 + $0x880] sm:$0xff]  ;;  %576 = vmatpush.msrb.mxu0 %v356_v40  ;;  %598 = vmatpush.msrb.mxu1 %v424_v41 }
  0x58   :  { %v420_v46 = vld [vmem:[%s4247_s1 + $0xaa0] sm:$0xff]  ;;  %623 = vmatpush.msrb.mxu2 %v97_v47  ;;  %645 = vmatpush.msrb.mxu3 %v165_v48 }
  0x59   :  { %v2482_v49 = vld [vmem:[%s4246_s0 + $0x180] sm:$0xff]  ;;  %577 = vmatpush.msrb.mxu0 %v352_v45  ;;  %599 = vmatpush.msrb.mxu1 %v420_v46 }
  0x5a   :  { %v348_v51 = vld [vmem:[%s4247_s1 + $0x860] sm:$0xff]  ;;  %493 = vmatmul.f32.gmra.mxu0 %v2482_v49  ;;  %559 = vmatmul.f32.vlgmr.msra.gmra.mxu3 %v2488_v50 }
  0x5b   :  { %v416_v52 = vld [vmem:[%s4247_s1 + $0xa80] sm:$0xff]  ;;  %578 = vmatpush.msrb.mxu0 %v348_v51  ;;  %624 = vmatpush.msrb.mxu2 %v93_v53 }
  0x5c   :  { %v344_v56 = vld [vmem:[%s4247_s1 + $0x840] sm:$0xff]  ;;  %600 = vmatpush.msrb.mxu1 %v416_v52  ;;  %646 = vmatpush.msrb.mxu3 %v161_v54 }
  0x5d   :  { %v412_v57 = vld [vmem:[%s4247_s1 + $0xa60] sm:$0xff]  ;;  %579 = vmatpush.msrb.mxu0 %v344_v56  ;;  %625 = vmatpush.msrb.mxu2 %v89_v58 }
  0x5e   :  { %v340_v60 = vld [vmem:[%s4247_s1 + $0x820] sm:$0xff]  ;;  %601 = vmatpush.msrb.mxu1 %v412_v57  ;;  %647 = vmatpush.msrb.mxu3 %v157_v59 }
  0x5f   :  { %v408_v61 = vld [vmem:[%s4247_s1 + $0xa40] sm:$0xff] }
  0x60   :  { %v336_v1 = vld [vmem:[%s4247_s1 + $0x800] sm:$0xff] }
  0x61   :  { %12 = vsyncpa [#allocation4], 0  ;;  %580 = vmatpush.msrb.mxu0 %v340_v60  ;;  %602 = vmatpush.msrb.mxu1 %v408_v61  ;;  %v404_v2 = vld [vmem:[%s4247_s1 + $0xa20] sm:$0xff]  ;;  %v81_v3 = vld [vmem:[%s4247_s1 + $0x8] sm:$0xff]  ;;  %s1962_s28 = sshll.u32 %s4253_s7, 4  ;;  %s2090_s29 = smov 128   ;;  %s1963_s28 = int_to_ptr.hbm [resolvable:$true] %s1962_s28 }
  0x62   :  { %626 = vmatpush.msrb.mxu2 %v85_v62  ;;  %648 = vmatpush.msrb.mxu3 %v153_v63  ;;  %v149_v4 = vld [vmem:[%s4247_s1 + $0x228] sm:$0xff]  ;;  %v2554_v5 = vld [vmem:[%s4246_s0 + $0x20] sm:$0xff]  ;;  %v2560_v6 = vld [vmem:[%s4246_s0 + $0x198] sm:$0xff] }
  0x63   :  { %539 = vmatmul.f32.gmra.mxu2 %v2537_v0  ;;  %581 = vmatpush.msrb.mxu0 %v336_v1  ;;  %v269_v7 = vld [vmem:[%s4247_s1 + $0x5e8] sm:$0xff]  ;;  %v400_v9 = vld [vmem:[%s4247_s1 + $0xa00] sm:$0xff] }
  0x64   :  { %603 = vmatpush.msrb.mxu1 %v404_v2  ;;  %627 = vmatpush.msrb.mxu2 %v81_v3  ;;  %v397_v8 = vld [vmem:[%s4247_s1 + $0x9e8] sm:$0xff]  ;;  %v2621_v24 = vld [vmem:[%s4246_s0 + $0x1a0] sm:$0xff] }
  0x65   :  { %649 = vmatpush.msrb.mxu3 %v149_v4  ;;  %582 = vmatmul.f32.vlgmr.msrb.gmra.mxu0 %v2554_v5  ;;  %v145_v10 = vld [vmem:[%s4247_s1 + $0x208] sm:$0xff] }
  0x66   :  { %v2578_v11 = vld [vmem:[%s4246_s0 + $0x28] sm:$0xff]  ;;  %562 = vmatmul.f32.gmra.mxu3 %v2560_v6  ;;  %658 = vmatpush.msra.mxu0 %v269_v7 }
  0x67   :  { %v265_v12 = vld [vmem:[%s4247_s1 + $0x5c8] sm:$0xff]  ;;  %704 = vmatpush.msra.mxu2 %v397_v8  ;;  %604 = vmatpush.msrb.mxu1 %v400_v9 }
  0x68   :  { %v333_v13 = vld [vmem:[%s4247_s1 + $0x7e8] sm:$0xff]  ;;  %650 = vmatpush.msrb.mxu3 %v145_v10  ;;  %605 = vmatmul.f32.vlgmr.msrb.gmra.mxu1 %v2578_v11 }
  0x69   :  { %v393_v14 = vld [vmem:[%s4247_s1 + $0x9c8] sm:$0xff]  ;;  %659 = vmatpush.msra.mxu0 %v265_v12  ;;  %681 = vmatpush.msra.mxu1 %v333_v13 }
  0x6a   :  { %v461_v15 = vld [vmem:[%s4247_s1 + $0xbe8] sm:$0xff]  ;;  %705 = vmatpush.msra.mxu2 %v393_v14 }
  0x6b   :  { %v261_v16 = vld [vmem:[%s4247_s1 + $0x5a8] sm:$0xff]  ;;  %727 = vmatpush.msra.mxu3 %v461_v15  ;;  %628 = vmatmul.f32.vlgmr.msrb.gmra.mxu2 %v2417_v30 }
  0x6c   :  { %v329_v17 = vld [vmem:[%s4247_s1 + $0x7c8] sm:$0xff]  ;;  %660 = vmatpush.msra.mxu0 %v261_v16 }
  0x6d   :  { %v389_v18 = vld [vmem:[%s4247_s1 + $0x9a8] sm:$0xff]  ;;  %682 = vmatpush.msra.mxu1 %v329_v17  ;;  %585 = vmatmul.f32.gmra.mxu0 %v2621_v24 }
  0x6e   :  { %v457_v19 = vld [vmem:[%s4247_s1 + $0xbc8] sm:$0xff]  ;;  %706 = vmatpush.msra.mxu2 %v389_v18  ;;  %651 = vmatmul.f32.vlgmr.msrb.gmra.mxu3 %v2434_v35 }
  0x6f   :  { %v257_v20 = vld [vmem:[%s4247_s1 + $0x588] sm:$0xff]  ;;  %728 = vmatpush.msra.mxu3 %v457_v19 }
  0x70   :  { %v325_v21 = vld [vmem:[%s4247_s1 + $0x7a8] sm:$0xff]  ;;  %661 = vmatpush.msra.mxu0 %v257_v20  ;;  %v142_v20 = vld [vmem:[%s4247_s1 + $0x1f0] sm:$0xff] }
  0x71   :  { %v385_v22 = vld [vmem:[%s4247_s1 + $0x988] sm:$0xff]  ;;  %683 = vmatpush.msra.mxu1 %v325_v21  ;;  %v270_v21 = vld [vmem:[%s4247_s1 + $0x5f0] sm:$0xff] }
  0x72   :  { %v453_v23 = vld [vmem:[%s4247_s1 + $0xba8] sm:$0xff]  ;;  %707 = vmatpush.msra.mxu2 %v385_v22 }
  0x73   :  { %v321_v25 = vld [vmem:[%s4247_s1 + $0x788] sm:$0xff]  ;;  %729 = vmatpush.msra.mxu3 %v453_v23  ;;  %631 = vmatmul.f32.gmra.mxu2 %v2482_v49 }
  0x74   :  { %v253_v26 = vld [vmem:[%s4247_s1 + $0x568] sm:$0xff]  ;;  %684 = vmatpush.msra.mxu1 %v321_v25  ;;  %v138_v25 = vld [vmem:[%s4247_s1 + $0x1d0] sm:$0xff] }
  0x75   :  { %v381_v27 = vld [vmem:[%s4247_s1 + $0x968] sm:$0xff]  ;;  %662 = vmatpush.msra.mxu0 %v253_v26  ;;  %v206_v26 = vld [vmem:[%s4247_s1 + $0x3f0] sm:$0xff] }
  0x76   :  { %v449_v28 = vld [vmem:[%s4247_s1 + $0xb88] sm:$0xff]  ;;  %708 = vmatpush.msra.mxu2 %v381_v27  ;;  %654 = vmatmul.f32.gmra.mxu3 %v2506_v55  ;;  %v266_v27 = vld [vmem:[%s4247_s1 + $0x5d0] sm:$0xff] }
  0x77   :  { %v2638_v29 = vld [vmem:[%s4246_s0 + $0x1a8] sm:$0xff]  ;;  %730 = vmatpush.msra.mxu3 %v449_v28  ;;  %v334_v28 = vld [vmem:[%s4247_s1 + $0x7f0] sm:$0xff] }
  0x78   :  { %v249_v31 = vld [vmem:[%s4247_s1 + $0x548] sm:$0xff]  ;;  %608 = vmatmul.f32.gmra.mxu1 %v2638_v29 }
  0x79   :  { %v317_v32 = vld [vmem:[%s4247_s1 + $0x768] sm:$0xff]  ;;  %663 = vmatpush.msra.mxu0 %v249_v31  ;;  %v134_v31 = vld [vmem:[%s4247_s1 + $0x1b0] sm:$0xff] }
  0x7a   :  { %v377_v33 = vld [vmem:[%s4247_s1 + $0x948] sm:$0xff]  ;;  %685 = vmatpush.msra.mxu1 %v317_v32  ;;  %v202_v32 = vld [vmem:[%s4247_s1 + $0x3d0] sm:$0xff] }
  0x7b   :  { %v445_v34 = vld [vmem:[%s4247_s1 + $0xb68] sm:$0xff]  ;;  %709 = vmatpush.msra.mxu2 %v377_v33  ;;  %v262_v33 = vld [vmem:[%s4247_s1 + $0x5b0] sm:$0xff] }
  0x7c   :  { %v245_v36 = vld [vmem:[%s4247_s1 + $0x528] sm:$0xff]  ;;  %731 = vmatpush.msra.mxu3 %v445_v34  ;;  %v330_v34 = vld [vmem:[%s4247_s1 + $0x7d0] sm:$0xff] }
  0x7d   :  { %v313_v37 = vld [vmem:[%s4247_s1 + $0x748] sm:$0xff]  ;;  %664 = vmatpush.msra.mxu0 %v245_v36  ;;  %v130_v36 = vld [vmem:[%s4247_s1 + $0x190] sm:$0xff] }
  0x7e   :  { %v373_v38 = vld [vmem:[%s4247_s1 + $0x928] sm:$0xff]  ;;  %686 = vmatpush.msra.mxu1 %v313_v37  ;;  %v198_v37 = vld [vmem:[%s4247_s1 + $0x3b0] sm:$0xff] }
  0x7f   :  { %v441_v39 = vld [vmem:[%s4247_s1 + $0xb48] sm:$0xff]  ;;  %710 = vmatpush.msra.mxu2 %v373_v38  ;;  %v258_v38 = vld [vmem:[%s4247_s1 + $0x590] sm:$0xff] }
  0x80   :  { %v241_v40 = vld [vmem:[%s4247_s1 + $0x508] sm:$0xff]  ;;  %732 = vmatpush.msra.mxu3 %v441_v39  ;;  %v326_v39 = vld [vmem:[%s4247_s1 + $0x7b0] sm:$0xff] }
  0x81   :  { %v309_v41 = vld [vmem:[%s4247_s1 + $0x728] sm:$0xff]  ;;  %665 = vmatpush.msra.mxu0 %v241_v40  ;;  %v126_v40 = vld [vmem:[%s4247_s1 + $0x170] sm:$0xff] }
  0x82   :  { %v369_v42 = vld [vmem:[%s4247_s1 + $0x908] sm:$0xff]  ;;  %687 = vmatpush.msra.mxu1 %v309_v41  ;;  %v194_v41 = vld [vmem:[%s4247_s1 + $0x390] sm:$0xff] }
  0x83   :  { %v437_v43 = vld [vmem:[%s4247_s1 + $0xb28] sm:$0xff]  ;;  %711 = vmatpush.msra.mxu2 %v369_v42  ;;  %v254_v42 = vld [vmem:[%s4247_s1 + $0x570] sm:$0xff] }
  0x84   :  { %v237_v45 = vld [vmem:[%s4247_s1 + $0x4e8] sm:$0xff]  ;;  %733 = vmatpush.msra.mxu3 %v437_v43  ;;  %v322_v43 = vld [vmem:[%s4247_s1 + $0x790] sm:$0xff] }
  0x85   :  { %v305_v46 = vld [vmem:[%s4247_s1 + $0x708] sm:$0xff]  ;;  %666 = vmatpush.msra.mxu0 %v237_v45  ;;  %v122_v45 = vld [vmem:[%s4247_s1 + $0x150] sm:$0xff] }
  0x86   :  { %v365_v47 = vld [vmem:[%s4247_s1 + $0x8e8] sm:$0xff]  ;;  %688 = vmatpush.msra.mxu1 %v305_v46  ;;  %v190_v46 = vld [vmem:[%s4247_s1 + $0x370] sm:$0xff] }
  0x87   :  { %v433_v48 = vld [vmem:[%s4247_s1 + $0xb08] sm:$0xff]  ;;  %712 = vmatpush.msra.mxu2 %v365_v47  ;;  %v250_v47 = vld [vmem:[%s4247_s1 + $0x550] sm:$0xff] }
  0x88   :  { %v233_v51 = vld [vmem:[%s4247_s1 + $0x4c8] sm:$0xff]  ;;  %734 = vmatpush.msra.mxu3 %v433_v48  ;;  %v318_v48 = vld [vmem:[%s4247_s1 + $0x770] sm:$0xff] }
  0x89   :  { %v301_v52 = vld [vmem:[%s4247_s1 + $0x6e8] sm:$0xff]  ;;  %667 = vmatpush.msra.mxu0 %v233_v51  ;;  %v118_v51 = vld [vmem:[%s4247_s1 + $0x130] sm:$0xff] }
  0x8a   :  { %v361_v53 = vld [vmem:[%s4247_s1 + $0x8c8] sm:$0xff]  ;;  %689 = vmatpush.msra.mxu1 %v301_v52  ;;  %v186_v52 = vld [vmem:[%s4247_s1 + $0x350] sm:$0xff] }
  0x8b   :  { %v429_v54 = vld [vmem:[%s4247_s1 + $0xae8] sm:$0xff]  ;;  %713 = vmatpush.msra.mxu2 %v361_v53  ;;  %v246_v53 = vld [vmem:[%s4247_s1 + $0x530] sm:$0xff] }
  0x8c   :  { %v229_v56 = vld [vmem:[%s4247_s1 + $0x4a8] sm:$0xff]  ;;  %735 = vmatpush.msra.mxu3 %v429_v54  ;;  %v314_v54 = vld [vmem:[%s4247_s1 + $0x750] sm:$0xff] }
  0x8d   :  { %v297_v57 = vld [vmem:[%s4247_s1 + $0x6c8] sm:$0xff]  ;;  %668 = vmatpush.msra.mxu0 %v229_v56  ;;  %v114_v56 = vld [vmem:[%s4247_s1 + $0x110] sm:$0xff] }
  0x8e   :  { %v357_v58 = vld [vmem:[%s4247_s1 + $0x8a8] sm:$0xff]  ;;  %690 = vmatpush.msra.mxu1 %v297_v57  ;;  %v182_v57 = vld [vmem:[%s4247_s1 + $0x330] sm:$0xff] }
  0x8f   :  { %v425_v59 = vld [vmem:[%s4247_s1 + $0xac8] sm:$0xff]  ;;  %714 = vmatpush.msra.mxu2 %v357_v58  ;;  %v242_v58 = vld [vmem:[%s4247_s1 + $0x510] sm:$0xff] }
  0x90   :  { %v225_v60 = vld [vmem:[%s4247_s1 + $0x488] sm:$0xff]  ;;  %736 = vmatpush.msra.mxu3 %v425_v59  ;;  %v310_v59 = vld [vmem:[%s4247_s1 + $0x730] sm:$0xff] }
  0x91   :  { %v293_v61 = vld [vmem:[%s4247_s1 + $0x6a8] sm:$0xff]  ;;  %669 = vmatpush.msra.mxu0 %v225_v60  ;;  %v110_v60 = vld [vmem:[%s4247_s1 + $0xf0] sm:$0xff] }
  0x92   :  { %v353_v62 = vld [vmem:[%s4247_s1 + $0x888] sm:$0xff]  ;;  %691 = vmatpush.msra.mxu1 %v293_v61  ;;  %v178_v61 = vld [vmem:[%s4247_s1 + $0x310] sm:$0xff] }
  0x93   :  { %v421_v63 = vld [vmem:[%s4247_s1 + $0xaa8] sm:$0xff]  ;;  %715 = vmatpush.msra.mxu2 %v353_v62  ;;  %v238_v62 = vld [vmem:[%s4247_s1 + $0x4f0] sm:$0xff] }
  0x94   :  { %v221_v1 = vld [vmem:[%s4247_s1 + $0x468] sm:$0xff]  ;;  %737 = vmatpush.msra.mxu3 %v421_v63  ;;  %v306_v63 = vld [vmem:[%s4247_s1 + $0x710] sm:$0xff] }
  0x95   :  { %v289_v2 = vld [vmem:[%s4247_s1 + $0x688] sm:$0xff]  ;;  %670 = vmatpush.msra.mxu0 %v221_v1  ;;  %v106_v1 = vld [vmem:[%s4247_s1 + $0xd0] sm:$0xff] }
  0x96   :  { %v349_v3 = vld [vmem:[%s4247_s1 + $0x868] sm:$0xff]  ;;  %692 = vmatpush.msra.mxu1 %v289_v2  ;;  %v174_v2 = vld [vmem:[%s4247_s1 + $0x2f0] sm:$0xff] }
  0x97   :  { %v417_v4 = vld [vmem:[%s4247_s1 + $0xa88] sm:$0xff]  ;;  %716 = vmatpush.msra.mxu2 %v349_v3  ;;  %v234_v3 = vld [vmem:[%s4247_s1 + $0x4d0] sm:$0xff] }
  0x98   :  { %v217_v7 = vld [vmem:[%s4247_s1 + $0x448] sm:$0xff]  ;;  %738 = vmatpush.msra.mxu3 %v417_v4  ;;  %v302_v4 = vld [vmem:[%s4247_s1 + $0x6f0] sm:$0xff] }
  0x99   :  { %v285_v8 = vld [vmem:[%s4247_s1 + $0x668] sm:$0xff]  ;;  %671 = vmatpush.msra.mxu0 %v217_v7  ;;  %v102_v7 = vld [vmem:[%s4247_s1 + $0xb0] sm:$0xff] }
  0x9a   :  { %v345_v9 = vld [vmem:[%s4247_s1 + $0x848] sm:$0xff]  ;;  %693 = vmatpush.msra.mxu1 %v285_v8  ;;  %v170_v8 = vld [vmem:[%s4247_s1 + $0x2d0] sm:$0xff] }
  0x9b   :  { %v413_v10 = vld [vmem:[%s4247_s1 + $0xa68] sm:$0xff]  ;;  %717 = vmatpush.msra.mxu2 %v345_v9  ;;  %v230_v9 = vld [vmem:[%s4247_s1 + $0x4b0] sm:$0xff] }
  0x9c   :  { %v213_v12 = vld [vmem:[%s4247_s1 + $0x428] sm:$0xff]  ;;  %739 = vmatpush.msra.mxu3 %v413_v10  ;;  %v298_v10 = vld [vmem:[%s4247_s1 + $0x6d0] sm:$0xff] }
  0x9d   :  { %v281_v13 = vld [vmem:[%s4247_s1 + $0x648] sm:$0xff]  ;;  %672 = vmatpush.msra.mxu0 %v213_v12  ;;  %v98_v12 = vld [vmem:[%s4247_s1 + $0x90] sm:$0xff] }
  0x9e   :  { %v341_v14 = vld [vmem:[%s4247_s1 + $0x828] sm:$0xff]  ;;  %694 = vmatpush.msra.mxu1 %v281_v13  ;;  %v166_v13 = vld [vmem:[%s4247_s1 + $0x2b0] sm:$0xff] }
  0x9f   :  { %v409_v15 = vld [vmem:[%s4247_s1 + $0xa48] sm:$0xff]  ;;  %718 = vmatpush.msra.mxu2 %v341_v14  ;;  %v226_v14 = vld [vmem:[%s4247_s1 + $0x490] sm:$0xff] }
  0xa0   :  { %v209_v16 = vld [vmem:[%s4247_s1 + $0x408] sm:$0xff]  ;;  %740 = vmatpush.msra.mxu3 %v409_v15  ;;  %v294_v15 = vld [vmem:[%s4247_s1 + $0x6b0] sm:$0xff] }
  0xa1   :  { %v277_v17 = vld [vmem:[%s4247_s1 + $0x628] sm:$0xff]  ;;  %673 = vmatpush.msra.mxu0 %v209_v16  ;;  %v94_v16 = vld [vmem:[%s4247_s1 + $0x70] sm:$0xff] }
  0xa2   :  { %v337_v18 = vld [vmem:[%s4247_s1 + $0x808] sm:$0xff]  ;;  %695 = vmatpush.msra.mxu1 %v277_v17  ;;  %674 = vmatmul.f32.vlgmr.msra.gmra.mxu0 %v2465_v44  ;;  %v162_v17 = vld [vmem:[%s4247_s1 + $0x290] sm:$0xff] }
  0xa3   :  { %v405_v19 = vld [vmem:[%s4247_s1 + $0xa28] sm:$0xff]  ;;  %719 = vmatpush.msra.mxu2 %v337_v18  ;;  %750 = vmatpush.msrb.mxu0 %v142_v20  ;;  %v222_v18 = vld [vmem:[%s4247_s1 + $0x470] sm:$0xff] }
  0xa4   :  { %v273_v22 = vld [vmem:[%s4247_s1 + $0x608] sm:$0xff]  ;;  %741 = vmatpush.msra.mxu3 %v405_v19  ;;  %720 = vmatmul.f32.vlgmr.msra.gmra.mxu2 %v2554_v5  ;;  %v290_v19 = vld [vmem:[%s4247_s1 + $0x690] sm:$0xff] }
  0xa5   :  { %v401_v23 = vld [vmem:[%s4247_s1 + $0xa08] sm:$0xff]  ;;  %796 = vmatpush.msrb.mxu2 %v270_v21  ;;  %696 = vmatpush.msra.mxu1 %v273_v22  ;;  %v90_v20 = vld [vmem:[%s4247_s1 + $0x50] sm:$0xff] }
  0xa6   :  { %742 = vmatpush.msra.mxu3 %v401_v23  ;;  %751 = vmatpush.msrb.mxu0 %v138_v25  ;;  %v158_v21 = vld [vmem:[%s4247_s1 + $0x270] sm:$0xff] }
  0xa7   :  { %743 = vmatmul.f32.vlgmr.msra.gmra.mxu3 %v2578_v11  ;;  %773 = vmatpush.msrb.mxu1 %v206_v26  ;;  %v218_v22 = vld [vmem:[%s4247_s1 + $0x450] sm:$0xff] }
  0xa8   :  { %797 = vmatpush.msrb.mxu2 %v266_v27  ;;  %819 = vmatpush.msrb.mxu3 %v334_v28  ;;  %v286_v23 = vld [vmem:[%s4247_s1 + $0x670] sm:$0xff] }
  0xa9   :  { %697 = vmatmul.f32.vlgmr.msra.gmra.mxu1 %v2488_v50  ;;  %752 = vmatpush.msrb.mxu0 %v134_v31  ;;  %v86_v25 = vld [vmem:[%s4247_s1 + $0x30] sm:$0xff] }
  0xaa   :  { %774 = vmatpush.msrb.mxu1 %v202_v32  ;;  %798 = vmatpush.msrb.mxu2 %v262_v33  ;;  %v154_v26 = vld [vmem:[%s4247_s1 + $0x250] sm:$0xff] }
  0xab   :  { %820 = vmatpush.msrb.mxu3 %v330_v34  ;;  %753 = vmatpush.msrb.mxu0 %v130_v36  ;;  %v214_v27 = vld [vmem:[%s4247_s1 + $0x430] sm:$0xff] }
  0xac   :  { %775 = vmatpush.msrb.mxu1 %v198_v37  ;;  %799 = vmatpush.msrb.mxu2 %v258_v38  ;;  %v282_v28 = vld [vmem:[%s4247_s1 + $0x650] sm:$0xff]  ;;  %v143_v37 = vld [vmem:[%s4247_s1 + $0x1f8] sm:$0xff] }
  0xad   :  { %821 = vmatpush.msrb.mxu3 %v326_v39  ;;  %723 = vmatmul.f32.gmra.mxu2 %v2621_v24  ;;  %v82_v31 = vld [vmem:[%s4247_s1 + $0x10] sm:$0xff] }
  0xae   :  { %754 = vmatpush.msrb.mxu0 %v126_v40  ;;  %776 = vmatpush.msrb.mxu1 %v194_v41  ;;  %v150_v32 = vld [vmem:[%s4247_s1 + $0x230] sm:$0xff] }
  0xaf   :  { %800 = vmatpush.msrb.mxu2 %v254_v42  ;;  %822 = vmatpush.msrb.mxu3 %v322_v43  ;;  %v210_v33 = vld [vmem:[%s4247_s1 + $0x410] sm:$0xff]  ;;  %v139_v42 = vld [vmem:[%s4247_s1 + $0x1d8] sm:$0xff] }
  0xb0   :  { %677 = vmatmul.f32.gmra.mxu0 %v2537_v0  ;;  %746 = vmatmul.f32.gmra.mxu3 %v2638_v29  ;;  %v278_v34 = vld [vmem:[%s4247_s1 + $0x630] sm:$0xff]  ;;  %v207_v43 = vld [vmem:[%s4247_s1 + $0x3f8] sm:$0xff] }
  0xb1   :  { %755 = vmatpush.msrb.mxu0 %v122_v45  ;;  %777 = vmatpush.msrb.mxu1 %v190_v46  ;;  %v398_v36 = vld [vmem:[%s4247_s1 + $0x9f0] sm:$0xff] }
  0xb2   :  { %801 = vmatpush.msrb.mxu2 %v250_v47  ;;  %823 = vmatpush.msrb.mxu3 %v318_v48  ;;  %v146_v38 = vld [vmem:[%s4247_s1 + $0x210] sm:$0xff]  ;;  %v135_v47 = vld [vmem:[%s4247_s1 + $0x1b8] sm:$0xff] }
  0xb3   :  { %700 = vmatmul.f32.gmra.mxu1 %v2560_v6  ;;  %756 = vmatpush.msrb.mxu0 %v118_v51  ;;  %v274_v39 = vld [vmem:[%s4247_s1 + $0x610] sm:$0xff]  ;;  %v203_v48 = vld [vmem:[%s4247_s1 + $0x3d8] sm:$0xff] }
  0xb4   :  { %778 = vmatpush.msrb.mxu1 %v186_v52  ;;  %802 = vmatpush.msrb.mxu2 %v246_v53  ;;  %v394_v40 = vld [vmem:[%s4247_s1 + $0x9d0] sm:$0xff]  ;;  %v131_v53 = vld [vmem:[%s4247_s1 + $0x198] sm:$0xff] }
  0xb5   :  { %824 = vmatpush.msrb.mxu3 %v314_v54  ;;  %757 = vmatpush.msrb.mxu0 %v114_v56  ;;  %v462_v41 = vld [vmem:[%s4247_s1 + $0xbf0] sm:$0xff]  ;;  %v199_v54 = vld [vmem:[%s4247_s1 + $0x3b8] sm:$0xff] }
  0xb6   :  { %779 = vmatpush.msrb.mxu1 %v182_v57  ;;  %803 = vmatpush.msrb.mxu2 %v242_v58  ;;  %v390_v45 = vld [vmem:[%s4247_s1 + $0x9b0] sm:$0xff]  ;;  %v127_v58 = vld [vmem:[%s4247_s1 + $0x178] sm:$0xff] }
  0xb7   :  { %825 = vmatpush.msrb.mxu3 %v310_v59  ;;  %758 = vmatpush.msrb.mxu0 %v110_v60  ;;  %v458_v46 = vld [vmem:[%s4247_s1 + $0xbd0] sm:$0xff]  ;;  %v195_v59 = vld [vmem:[%s4247_s1 + $0x398] sm:$0xff] }
  0xb8   :  { %780 = vmatpush.msrb.mxu1 %v178_v61  ;;  %804 = vmatpush.msrb.mxu2 %v238_v62  ;;  %v386_v51 = vld [vmem:[%s4247_s1 + $0x990] sm:$0xff]  ;;  %v123_v62 = vld [vmem:[%s4247_s1 + $0x158] sm:$0xff] }
  0xb9   :  { %826 = vmatpush.msrb.mxu3 %v306_v63  ;;  %759 = vmatpush.msrb.mxu0 %v106_v1  ;;  %v454_v52 = vld [vmem:[%s4247_s1 + $0xbb0] sm:$0xff]  ;;  %v191_v63 = vld [vmem:[%s4247_s1 + $0x378] sm:$0xff] }
  0xba   :  { %781 = vmatpush.msrb.mxu1 %v174_v2  ;;  %805 = vmatpush.msrb.mxu2 %v234_v3  ;;  %v382_v56 = vld [vmem:[%s4247_s1 + $0x970] sm:$0xff]  ;;  %v119_v3 = vld [vmem:[%s4247_s1 + $0x138] sm:$0xff] }
  0xbb   :  { %827 = vmatpush.msrb.mxu3 %v302_v4  ;;  %760 = vmatpush.msrb.mxu0 %v102_v7  ;;  %v450_v57 = vld [vmem:[%s4247_s1 + $0xb90] sm:$0xff]  ;;  %v187_v4 = vld [vmem:[%s4247_s1 + $0x358] sm:$0xff] }
  0xbc   :  { %782 = vmatpush.msrb.mxu1 %v170_v8  ;;  %806 = vmatpush.msrb.mxu2 %v230_v9  ;;  %v378_v60 = vld [vmem:[%s4247_s1 + $0x950] sm:$0xff]  ;;  %v115_v9 = vld [vmem:[%s4247_s1 + $0x118] sm:$0xff] }
  0xbd   :  { %828 = vmatpush.msrb.mxu3 %v298_v10  ;;  %761 = vmatpush.msrb.mxu0 %v98_v12  ;;  %v446_v61 = vld [vmem:[%s4247_s1 + $0xb70] sm:$0xff]  ;;  %v183_v10 = vld [vmem:[%s4247_s1 + $0x338] sm:$0xff] }
  0xbe   :  { %783 = vmatpush.msrb.mxu1 %v166_v13  ;;  %807 = vmatpush.msrb.mxu2 %v226_v14  ;;  %v374_v1 = vld [vmem:[%s4247_s1 + $0x930] sm:$0xff]  ;;  %v111_v14 = vld [vmem:[%s4247_s1 + $0xf8] sm:$0xff] }
  0xbf   :  { %829 = vmatpush.msrb.mxu3 %v294_v15  ;;  %762 = vmatpush.msrb.mxu0 %v94_v16  ;;  %v442_v2 = vld [vmem:[%s4247_s1 + $0xb50] sm:$0xff]  ;;  %v179_v15 = vld [vmem:[%s4247_s1 + $0x318] sm:$0xff] }
  0xc0   :  { %784 = vmatpush.msrb.mxu1 %v162_v17  ;;  %808 = vmatpush.msrb.mxu2 %v222_v18  ;;  %v370_v7 = vld [vmem:[%s4247_s1 + $0x910] sm:$0xff]  ;;  %v107_v18 = vld [vmem:[%s4247_s1 + $0xd8] sm:$0xff] }
  0xc1   :  { %830 = vmatpush.msrb.mxu3 %v290_v19  ;;  %763 = vmatpush.msrb.mxu0 %v90_v20  ;;  %v438_v8 = vld [vmem:[%s4247_s1 + $0xb30] sm:$0xff]  ;;  %v175_v19 = vld [vmem:[%s4247_s1 + $0x2f8] sm:$0xff] }
  0xc2   :  { %785 = vmatpush.msrb.mxu1 %v158_v21  ;;  %809 = vmatpush.msrb.mxu2 %v218_v22  ;;  %v434_v12 = vld [vmem:[%s4247_s1 + $0xb10] sm:$0xff]  ;;  %v103_v21 = vld [vmem:[%s4247_s1 + $0xb8] sm:$0xff] }
  0xc3   :  { %831 = vmatpush.msrb.mxu3 %v286_v23  ;;  %764 = vmatpush.msrb.mxu0 %v86_v25  ;;  %v366_v13 = vld [vmem:[%s4247_s1 + $0x8f0] sm:$0xff]  ;;  %v171_v22 = vld [vmem:[%s4247_s1 + $0x2d8] sm:$0xff] }
  0xc4   :  { %786 = vmatpush.msrb.mxu1 %v154_v26  ;;  %810 = vmatpush.msrb.mxu2 %v214_v27  ;;  %v362_v16 = vld [vmem:[%s4247_s1 + $0x8d0] sm:$0xff]  ;;  %v99_v25 = vld [vmem:[%s4247_s1 + $0x98] sm:$0xff] }
  0xc5   :  { %832 = vmatpush.msrb.mxu3 %v282_v28  ;;  %765 = vmatpush.msrb.mxu0 %v82_v31  ;;  %v430_v17 = vld [vmem:[%s4247_s1 + $0xaf0] sm:$0xff]  ;;  %v167_v26 = vld [vmem:[%s4247_s1 + $0x2b8] sm:$0xff] }
  0xc6   :  { %787 = vmatpush.msrb.mxu1 %v150_v32  ;;  %811 = vmatpush.msrb.mxu2 %v210_v33  ;;  %v426_v20 = vld [vmem:[%s4247_s1 + $0xad0] sm:$0xff]  ;;  %v95_v31 = vld [vmem:[%s4247_s1 + $0x78] sm:$0xff] }
  0xc7   :  { %833 = vmatpush.msrb.mxu3 %v278_v34  ;;  %842 = vmatpush.msra.mxu0 %v398_v36  ;;  %v422_v23 = vld [vmem:[%s4247_s1 + $0xab0] sm:$0xff]  ;;  %v159_v34 = vld [vmem:[%s4247_s1 + $0x278] sm:$0xff] }
  0xc8   :  { %888 = vmatpush.msra.mxu2 %v143_v37  ;;  %788 = vmatpush.msrb.mxu1 %v146_v38  ;;  %v350_v27 = vld [vmem:[%s4247_s1 + $0x870] sm:$0xff]  ;;  %v87_v37 = vld [vmem:[%s4247_s1 + $0x38] sm:$0xff] }
  0xc9   :  { %834 = vmatpush.msrb.mxu3 %v274_v39  ;;  %843 = vmatpush.msra.mxu0 %v394_v40  ;;  %v418_v28 = vld [vmem:[%s4247_s1 + $0xa90] sm:$0xff]  ;;  %v155_v38 = vld [vmem:[%s4247_s1 + $0x258] sm:$0xff] }
  0xca   :  { %865 = vmatpush.msra.mxu1 %v462_v41  ;;  %889 = vmatpush.msra.mxu2 %v139_v42  ;;  %v346_v32 = vld [vmem:[%s4247_s1 + $0x850] sm:$0xff]  ;;  %v83_v40 = vld [vmem:[%s4247_s1 + $0x18] sm:$0xff]  ;;  %v3179_v42 = vld [vmem:[%s4248_s2] sm:$0xf] }
  0xcb   :  { %911 = vmatpush.msra.mxu3 %v207_v43  ;;  %844 = vmatpush.msra.mxu0 %v390_v45  ;;  %v414_v33 = vld [vmem:[%s4247_s1 + $0xa70] sm:$0xff]  ;;  %v151_v41 = vld [vmem:[%s4247_s1 + $0x238] sm:$0xff] }
  0xcc   :  { %866 = vmatpush.msra.mxu1 %v458_v46  ;;  %890 = vmatpush.msra.mxu2 %v135_v47  ;;  %v410_v36 = vld [vmem:[%s4247_s1 + $0xa50] sm:$0xff]  ;;  %v271_v43 = vld [vmem:[%s4247_s1 + $0x5f8] sm:$0xff] }
  0xcd   :  { %912 = vmatpush.msra.mxu3 %v203_v48  ;;  %845 = vmatpush.msra.mxu0 %v386_v51  ;;  %v406_v39 = vld [vmem:[%s4247_s1 + $0xa30] sm:$0xff]  ;;  %v399_v46 = vld [vmem:[%s4247_s1 + $0x9f8] sm:$0xff]  ;;  %v466_v48 = vperm.slane %v3179_v42, 0  ;;  %v514_v51 = vpop.f32.mrf.mxu1 }
  0xce   :  { %867 = vmatpush.msra.mxu1 %v454_v52  ;;  %891 = vmatpush.msra.mxu2 %v131_v53  ;;  %v491_v45 = vpop.f32.mrf.mxu0  ;;  %v402_v47 = vld [vmem:[%s4247_s1 + $0xa10] sm:$0xff]  ;;  %v267_v52 = vld [vmem:[%s4247_s1 + $0x5d8] sm:$0xff] }
  0xcf   :  { %913 = vmatpush.msra.mxu3 %v199_v54  ;;  %846 = vmatpush.msra.mxu0 %v382_v56  ;;  %v335_v53 = vld [vmem:[%s4247_s1 + $0x7f8] sm:$0xff] }
  0xd0   :  { %868 = vmatpush.msra.mxu1 %v450_v57  ;;  %892 = vmatpush.msra.mxu2 %v127_v58  ;;  %v463_v54 = vld [vmem:[%s4247_s1 + $0xbf8] sm:$0xff] }
  0xd1   :  { %914 = vmatpush.msra.mxu3 %v195_v59  ;;  %847 = vmatpush.msra.mxu0 %v378_v60  ;;  %v331_v56 = vld [vmem:[%s4247_s1 + $0x7d8] sm:$0xff]  ;;  %v492_v59 = vadd.f32 %v491_v45, %v466_v48 }
  0xd2   :  { %869 = vmatpush.msra.mxu1 %v446_v61  ;;  %893 = vmatpush.msra.mxu2 %v123_v62  ;;  %v391_v57 = vld [vmem:[%s4247_s1 + $0x9b8] sm:$0xff] }
  0xd3   :  { %915 = vmatpush.msra.mxu3 %v191_v63  ;;  %848 = vmatpush.msra.mxu0 %v374_v1  ;;  %v459_v58 = vld [vmem:[%s4247_s1 + $0xbd8] sm:$0xff] }
  0xd4   :  { %870 = vmatpush.msra.mxu1 %v442_v2  ;;  %894 = vmatpush.msra.mxu2 %v119_v3  ;;  %v327_v60 = vld [vmem:[%s4247_s1 + $0x7b8] sm:$0xff] }
  0xd5   :  { %916 = vmatpush.msra.mxu3 %v187_v4  ;;  %849 = vmatpush.msra.mxu0 %v370_v7  ;;  %v387_v61 = vld [vmem:[%s4247_s1 + $0x998] sm:$0xff]  ;;  %v515_v4 = vadd.f32 %v514_v51, %v492_v59 }
  0xd6   :  { %871 = vmatpush.msra.mxu1 %v438_v8  ;;  %895 = vmatpush.msra.mxu2 %v115_v9  ;;  %v455_v62 = vld [vmem:[%s4247_s1 + $0xbb8] sm:$0xff] }
  0xd7   :  { %917 = vmatpush.msra.mxu3 %v183_v10  ;;  %766 = vmatmul.f32.vlgmr.msrb.gmra.mxu0 %v2417_v30  ;;  %v358_v30 = vld [vmem:[%s4247_s1 + $0x8b0] sm:$0xff]  ;;  %v323_v63 = vld [vmem:[%s4247_s1 + $0x798] sm:$0xff]  ;;  %v494_v1 = vpop.f32.mrf.mxu0  ;;  %v517_v10 = vpop.f32.mrf.mxu1 }
  0xd8   :  { %872 = vmatpush.msra.mxu1 %v434_v12  ;;  %850 = vmatpush.msra.mxu0 %v366_v13  ;;  %v255_v2 = vld [vmem:[%s4247_s1 + $0x578] sm:$0xff]  ;;  %v537_v13 = vpop.f32.mrf.mxu2 }
  0xd9   :  { %896 = vmatpush.msra.mxu2 %v111_v14  ;;  %918 = vmatpush.msra.mxu3 %v179_v15  ;;  %v383_v3 = vld [vmem:[%s4247_s1 + $0x978] sm:$0xff] }
  0xda   :  { %789 = vmatmul.f32.vlgmr.msrb.gmra.mxu1 %v2434_v35  ;;  %851 = vmatpush.msra.mxu0 %v362_v16  ;;  %v354_v35 = vld [vmem:[%s4247_s1 + $0x890] sm:$0xff]  ;;  %v451_v7 = vld [vmem:[%s4247_s1 + $0xb98] sm:$0xff]  ;;  %v538_v16 = vadd.f32 %v537_v13, %v515_v4 }
  0xdb   :  { %873 = vmatpush.msra.mxu1 %v430_v17  ;;  %897 = vmatpush.msra.mxu2 %v107_v18  ;;  %v251_v8 = vld [vmem:[%s4247_s1 + $0x558] sm:$0xff] }
  0xdc   :  { %919 = vmatpush.msra.mxu3 %v175_v19  ;;  %852 = vmatpush.msra.mxu0 %v358_v30  ;;  %v319_v9 = vld [vmem:[%s4247_s1 + $0x778] sm:$0xff]  ;;  %v495_v30 = vadd.f32 %v494_v1, %v466_v48 }
  0xdd   :  { %874 = vmatpush.msra.mxu1 %v426_v20  ;;  %898 = vmatpush.msra.mxu2 %v103_v21  ;;  %v379_v12 = vld [vmem:[%s4247_s1 + $0x958] sm:$0xff]  ;;  %v560_v20 = vpop.f32.mrf.mxu3 }
  0xde   :  { %920 = vmatpush.msra.mxu3 %v171_v22  ;;  %812 = vmatmul.f32.vlgmr.msrb.gmra.mxu2 %v2465_v44  ;;  %v163_v44 = vld [vmem:[%s4247_s1 + $0x298] sm:$0xff] }
  0xdf   :  { %853 = vmatpush.msra.mxu0 %v354_v35  ;;  %875 = vmatpush.msra.mxu1 %v422_v23  ;;  %v247_v14 = vld [vmem:[%s4247_s1 + $0x538] sm:$0xff]  ;;  %v561_v35 = vadd.f32 %v560_v20, %v538_v16 }
  0xe0   :  { %899 = vmatpush.msra.mxu2 %v99_v25  ;;  %921 = vmatpush.msra.mxu3 %v167_v26  ;;  %v315_v15 = vld [vmem:[%s4247_s1 + $0x758] sm:$0xff] }
  0xe1   :  { %769 = vmatmul.f32.gmra.mxu0 %v2482_v49  ;;  %835 = vmatmul.f32.vlgmr.msrb.gmra.mxu3 %v2488_v50  ;;  %v91_v49 = vld [vmem:[%s4247_s1 + $0x58] sm:$0xff]  ;;  %v342_v50 = vld [vmem:[%s4247_s1 + $0x830] sm:$0xff] }
  0xe2   :  { %854 = vmatpush.msra.mxu0 %v350_v27  ;;  %876 = vmatpush.msra.mxu1 %v418_v28  ;;  %v375_v17 = vld [vmem:[%s4247_s1 + $0x938] sm:$0xff]  ;;  %v583_v27 = vpop.f32.mrf.mxu0 }
  0xe3   :  { %900 = vmatpush.msra.mxu2 %v95_v31  ;;  %922 = vmatpush.msra.mxu3 %v163_v44  ;;  %v443_v18 = vld [vmem:[%s4247_s1 + $0xb58] sm:$0xff]  ;;  %v518_v44 = vadd.f32 %v517_v10, %v495_v30  ;;  %v2053_v10 = vld [vmem:[%s4246_s0 + $0x188] sm:$0xff] }
  0xe4   :  { %792 = vmatmul.f32.gmra.mxu1 %v2506_v55  ;;  %855 = vmatpush.msra.mxu0 %v346_v32  ;;  %v338_v55 = vld [vmem:[%s4247_s1 + $0x810] sm:$0xff]  ;;  %v311_v19 = vld [vmem:[%s4247_s1 + $0x738] sm:$0xff]  ;;  %v584_v32 = vadd.f32 %v583_v27, %v561_v35  ;;  %v2055_v27 = vld [vmem:[%s4246_s0 + $0x20] sm:$0xff] }
  0xe5   :  { %877 = vmatpush.msra.mxu1 %v414_v33  ;;  %901 = vmatpush.msra.mxu2 %v91_v49  ;;  %v371_v21 = vld [vmem:[%s4247_s1 + $0x918] sm:$0xff]  ;;  %v2050_v33 = vld [vmem:[%s4246_s0] sm:$0xff] }
  0xe6   :  { %923 = vmatpush.msra.mxu3 %v159_v34  ;;  %856 = vmatpush.msra.mxu0 %v342_v50  ;;  %v439_v22 = vld [vmem:[%s4247_s1 + $0xb38] sm:$0xff] }
  0xe7   :  { %878 = vmatpush.msra.mxu1 %v410_v36  ;;  %902 = vmatpush.msra.mxu2 %v87_v37  ;;  %v239_v23 = vld [vmem:[%s4247_s1 + $0x4f8] sm:$0xff]  ;;  %v606_v36 = vpop.f32.mrf.mxu1 }
  0xe8   :  { %924 = vmatpush.msra.mxu3 %v155_v38  ;;  %815 = vmatmul.f32.gmra.mxu2 %v2537_v0  ;;  %v147_v0 = vld [vmem:[%s4247_s1 + $0x218] sm:$0xff] }
  0xe9   :  { %857 = vmatpush.msra.mxu0 %v338_v55  ;;  %879 = vmatpush.msra.mxu1 %v406_v39  ;;  %v307_v25 = vld [vmem:[%s4247_s1 + $0x718] sm:$0xff]  ;;  %v3317_v55 = vadd.f32 %v606_v36, %v584_v32  ;;  %v540_v39 = vpop.f32.mrf.mxu2  ;;  %v1406_v36 = vld [vmem:[%s4249_s3 + $0xe0] sm:$0xff] }
  0xea   :  { %903 = vmatpush.msra.mxu2 %v83_v40  ;;  %925 = vmatpush.msra.mxu3 %v151_v41  ;;  %v367_v26 = vld [vmem:[%s4247_s1 + $0x8f8] sm:$0xff]  ;;  %v2051_v40 = vld [vmem:[%s4246_s0 + $0x8] sm:$0xff]  ;;  %v541_v45 = vadd.f32 %v540_v39, %v518_v44  ;;  %v1404_v39 = vld [vmem:[%s4249_s3 + $0xd0] sm:$0xff] }
  0xeb   :  { %858 = vmatmul.f32.vlgmr.msra.gmra.mxu0 %v2554_v5  ;;  %838 = vmatmul.f32.gmra.mxu3 %v2560_v6  ;;  %v395_v5 = vld [vmem:[%s4247_s1 + $0x9d8] sm:$0xff] }
  0xec   :  { %934 = vmatpush.msrb.mxu0 %v271_v43  ;;  %980 = vmatpush.msrb.mxu2 %v399_v46  ;;  %v263_v6 = vld [vmem:[%s4247_s1 + $0x5b8] sm:$0xff] }
  0xed   :  { %880 = vmatpush.msra.mxu1 %v402_v47  ;;  %926 = vmatpush.msra.mxu3 %v147_v0  ;;  %v435_v28 = vld [vmem:[%s4247_s1 + $0xb18] sm:$0xff]  ;;  %v3335_v0 = vmul.f32 0.70710677, %v3317_v55 }
  0xee   :  { %881 = vmatmul.f32.vlgmr.msra.gmra.mxu1 %v2578_v11  ;;  %935 = vmatpush.msrb.mxu0 %v267_v52  ;;  %v259_v11 = vld [vmem:[%s4247_s1 + $0x598] sm:$0xff]  ;;  %v563_v52 = vpop.f32.mrf.mxu3 }
  0xef   :  { %957 = vmatpush.msrb.mxu1 %v335_v53  ;;  %981 = vmatpush.msrb.mxu2 %v395_v5  ;;  %v235_v31 = vld [vmem:[%s4247_s1 + $0x4d8] sm:$0xff]  ;;  %v1042_v5 = vmul.f32 %v3335_v0, %v3335_v0 }
  0xf0   :  { %1003 = vmatpush.msrb.mxu3 %v463_v54  ;;  %936 = vmatpush.msrb.mxu0 %v263_v6  ;;  %v303_v49 = vld [vmem:[%s4247_s1 + $0x6f8] sm:$0xff]  ;;  %v564_v54 = vadd.f32 %v563_v52, %v541_v45  ;;  %v2058_v52 = vld [vmem:[%s4246_s0 + $0x190] sm:$0xff] }
  0xf1   :  { %958 = vmatpush.msrb.mxu1 %v331_v56  ;;  %982 = vmatpush.msrb.mxu2 %v391_v57  ;;  %v363_v34 = vld [vmem:[%s4247_s1 + $0x8d8] sm:$0xff]  ;;  %v3360_v59 = vmin.f32 %v1042_v5, 16.0 }
  0xf2   :  { %1004 = vmatpush.msrb.mxu3 %v459_v58  ;;  %937 = vmatpush.msrb.mxu0 %v259_v11  ;;  %v431_v50 = vld [vmem:[%s4247_s1 + $0xaf8] sm:$0xff]  ;;  %v586_v11 = vpop.f32.mrf.mxu0 }
  0xf3   :  { %959 = vmatpush.msrb.mxu1 %v327_v60  ;;  %983 = vmatpush.msrb.mxu2 %v387_v61  ;;  %v231_v37 = vld [vmem:[%s4247_s1 + $0x4b8] sm:$0xff]  ;;  %v2052_v60 = vld [vmem:[%s4246_s0 + $0x180] sm:$0xff] }
  0xf4   :  { %1005 = vmatpush.msrb.mxu3 %v455_v62  ;;  %861 = vmatmul.f32.gmra.mxu0 %v2621_v24  ;;  %v447_v24 = vld [vmem:[%s4247_s1 + $0xb78] sm:$0xff]  ;;  %v587_v62 = vadd.f32 %v586_v11, %v564_v54  ;;  %v1400_v54 = vld [vmem:[%s4249_s3 + $0xb0] sm:$0xff] }
  0xf5   :  { %960 = vmatpush.msrb.mxu1 %v323_v63  ;;  %938 = vmatpush.msrb.mxu0 %v255_v2  ;;  %v299_v38 = vld [vmem:[%s4247_s1 + $0x6d8] sm:$0xff]  ;;  %v1044_v2 = vmul.f32 2.1237322e-06, %v3360_v59  ;;  %v609_v4 = vpop.f32.mrf.mxu1 }
  0xf6   :  { %984 = vmatpush.msrb.mxu2 %v383_v3  ;;  %1006 = vmatpush.msrb.mxu3 %v451_v7  ;;  %v359_v41 = vld [vmem:[%s4247_s1 + $0x8b8] sm:$0xff]  ;;  %v1055_v3 = vmul.f32 3.8918573e-05, %v3360_v59 }
  0xf7   :  { %884 = vmatmul.f32.gmra.mxu1 %v2638_v29  ;;  %939 = vmatpush.msrb.mxu0 %v251_v8  ;;  %v243_v29 = vld [vmem:[%s4247_s1 + $0x518] sm:$0xff]  ;;  %v1045_v13 = vadd.f32 0.00028619796, %v1044_v2 }
  0xf8   :  { %961 = vmatpush.msrb.mxu1 %v319_v9  ;;  %985 = vmatpush.msrb.mxu2 %v379_v12  ;;  %v427_v43 = vld [vmem:[%s4247_s1 + $0xad8] sm:$0xff]  ;;  %v3382_v9 = vadd.f32 %v609_v4, %v587_v62  ;;  %v1398_v62 = vld [vmem:[%s4249_s3 + $0xa0] sm:$0xff] }
  0xf9   :  { %1007 = vmatpush.msrb.mxu3 %v447_v24  ;;  %940 = vmatpush.msrb.mxu0 %v247_v14  ;;  %v227_v46 = vld [vmem:[%s4247_s1 + $0x498] sm:$0xff]  ;;  %v1056_v14 = vadd.f32 0.001143296, %v1055_v3  ;;  %v1396_v3 = vld [vmem:[%s4249_s3 + $0x90] sm:$0xff] }
  0xfa   :  { %962 = vmatpush.msrb.mxu1 %v315_v15  ;;  %986 = vmatpush.msrb.mxu2 %v375_v17  ;;  %v295_v47 = vld [vmem:[%s4247_s1 + $0x6b8] sm:$0xff]  ;;  %v3400_v17 = vmul.f32 0.70710677, %v3382_v9 }
  0xfb   :  { %1008 = vmatpush.msrb.mxu3 %v443_v18  ;;  %941 = vmatpush.msrb.mxu0 %v243_v29  ;;  %v355_v48 = vld [vmem:[%s4247_s1 + $0x898] sm:$0xff]  ;;  %v1057_v30 = vmul.f32 %v1056_v14, %v3360_v59 }
  0xfc   :  { %963 = vmatpush.msrb.mxu1 %v311_v19  ;;  %987 = vmatpush.msrb.mxu2 %v371_v21  ;;  %v423_v51 = vld [vmem:[%s4247_s1 + $0xab8] sm:$0xff]  ;;  %v1046_v19 = vmul.f32 %v1045_v13, %v3360_v59  ;;  %v1202_v20 = vmul.f32 %v3400_v17, %v3400_v17 }
  0xfd   :  { %1009 = vmatpush.msrb.mxu3 %v439_v22  ;;  %904 = vmatmul.f32.vlgmr.msra.gmra.mxu2 %v2050_v33  ;;  %v223_v53 = vld [vmem:[%s4247_s1 + $0x478] sm:$0xff] }
  0xfe   :  { %942 = vmatpush.msrb.mxu0 %v239_v23  ;;  %964 = vmatpush.msrb.mxu1 %v307_v25  ;;  %v291_v6 = vld [vmem:[%s4247_s1 + $0x698] sm:$0xff]  ;;  %v1047_v35 = vadd.f32 0.0036580483, %v1046_v19  ;;  %v1058_v23 = vadd.f32 0.014752088, %v1057_v30  ;;  %v3418_v25 = vmin.f32 %v1202_v20, 16.0 }
  0xff   :  { %988 = vmatpush.msrb.mxu2 %v367_v26  ;;  %1010 = vmatpush.msrb.mxu3 %v435_v28  ;;  %v351_v56 = vld [vmem:[%s4247_s1 + $0x878] sm:$0xff]  ;;  %v2054_v26 = vld [vmem:[%s4246_s0 + $0x10] sm:$0xff]  ;;  %v1390_v20 = vld [vmem:[%s4249_s3 + $0x60] sm:$0xff] }
 0x100   :  { %943 = vmatpush.msrb.mxu0 %v235_v31  ;;  %927 = vmatmul.f32.vlgmr.msra.gmra.mxu3 %v2051_v40  ;;  %v419_v57 = vld [vmem:[%s4247_s1 + $0xa98] sm:$0xff]  ;;  %v1059_v28 = vmul.f32 %v1058_v23, %v3360_v59  ;;  %v1408_v31 = vld [vmem:[%s4249_s3 + $0xf0] sm:$0xff]  ;;  %v1204_v44 = vmul.f32 2.1237322e-06, %v3418_v25  ;;  %v1215_v32 = vmul.f32 3.8918573e-05, %v3418_v25 }
 0x101   :  { %965 = vmatpush.msrb.mxu1 %v303_v49  ;;  %989 = vmatpush.msrb.mxu2 %v363_v34  ;;  %v219_v58 = vld [vmem:[%s4247_s1 + $0x458] sm:$0xff]  ;;  %v2057_v49 = vld [vmem:[%s4246_s0 + $0x28] sm:$0xff]  ;;  %v1048_v34 = vmul.f32 %v1047_v35, %v3360_v59  ;;  %v1436_v35 = vld [vmem:[%s4249_s3 + $0x1d0] sm:$0xff] }
 0x102   :  { %1011 = vmatpush.msrb.mxu3 %v431_v50  ;;  %944 = vmatpush.msrb.mxu0 %v231_v37  ;;  %v287_v61 = vld [vmem:[%s4247_s1 + $0x678] sm:$0xff]  ;;  %v1060_v50 = vadd.f32 0.112945676, %v1059_v28  ;;  %v1205_v37 = vadd.f32 0.00028619796, %v1204_v44 }
 0x103   :  { %966 = vmatpush.msrb.mxu1 %v299_v38  ;;  %990 = vmatpush.msrb.mxu2 %v359_v41  ;;  %v347_v63 = vld [vmem:[%s4247_s1 + $0x858] sm:$0xff]  ;;  %v1216_v40 = vadd.f32 0.001143296, %v1215_v32  ;;  %v1049_v45 = vadd.f32 0.05243302, %v1048_v34 }
 0x104   :  { %1012 = vmatpush.msrb.mxu3 %v427_v43  ;;  %945 = vmatpush.msrb.mxu0 %v227_v46  ;;  %v415_v1 = vld [vmem:[%s4247_s1 + $0xa78] sm:$0xff]  ;;  %v1061_v38 = vmul.f32 %v1060_v50, %v3360_v59  ;;  %v1206_v41 = vmul.f32 %v1205_v37, %v3418_v25  ;;  %v629_v43 = vpop.f32.mrf.mxu2  ;;  %v1386_v50 = vld [vmem:[%s4249_s3 + $0x40] sm:$0xff] }
 0x105   :  { %967 = vmatpush.msrb.mxu1 %v295_v47  ;;  %991 = vmatpush.msrb.mxu2 %v355_v48  ;;  %v215_v7 = vld [vmem:[%s4247_s1 + $0x438] sm:$0xff]  ;;  %v1402_v47 = vld [vmem:[%s4249_s3 + $0xc0] sm:$0xff]  ;;  %v1217_v48 = vmul.f32 %v1216_v40, %v3418_v25  ;;  %v1432_v40 = vld [vmem:[%s4249_s3 + $0x1b0] sm:$0xff] }
 0x106   :  { %1013 = vmatpush.msrb.mxu3 %v423_v51  ;;  %907 = vmatmul.f32.gmra.mxu2 %v2052_v60  ;;  %v283_v8 = vld [vmem:[%s4247_s1 + $0x658] sm:$0xff]  ;;  %v1062_v46 = vadd.f32 0.4994258, %v1061_v38  ;;  %v1207_v5 = vadd.f32 0.0036580483, %v1206_v41 }
 0x107   :  { %946 = vmatpush.msrb.mxu0 %v223_v53  ;;  %968 = vmatpush.msrb.mxu1 %v291_v6  ;;  %v343_v12 = vld [vmem:[%s4247_s1 + $0x838] sm:$0xff]  ;;  %v2059_v53 = vld [vmem:[%s4246_s0 + $0x1a0] sm:$0xff]  ;;  %v467_v6 = vperm.slane %v3179_v42, 1 }
 0x108   :  { %992 = vmatpush.msrb.mxu2 %v351_v56  ;;  %1014 = vmatpush.msrb.mxu3 %v419_v57  ;;  %v411_v24 = vld [vmem:[%s4247_s1 + $0xa58] sm:$0xff]  ;;  %v1063_v51 = vmul.f32 %v1062_v46, %v3360_v59  ;;  %v652_v56 = vpop.f32.mrf.mxu3  ;;  %v1218_v57 = vadd.f32 0.014752088, %v1217_v48 }
 0x109   :  { %947 = vmatpush.msrb.mxu0 %v219_v58  ;;  %930 = vmatmul.f32.gmra.mxu3 %v2053_v10  ;;  %v211_v15 = vld [vmem:[%s4247_s1 + $0x418] sm:$0xff]  ;;  %v1050_v58 = vmul.f32 %v1049_v45, %v3360_v59  ;;  %v630_v2 = vadd.f32 %v629_v43, %v467_v6  ;;  %v1384_v43 = vld [vmem:[%s4249_s3 + $0x30] sm:$0xff] }
 0x10a   :  { %969 = vmatpush.msrb.mxu1 %v287_v61  ;;  %993 = vmatpush.msrb.mxu2 %v347_v63  ;;  %v279_v16 = vld [vmem:[%s4247_s1 + $0x638] sm:$0xff]  ;;  %v3463_v11 = vadd.f32 1.0, %v1063_v51  ;;  %v2061_v61 = vld [vmem:[%s4246_s0 + $0x1a8] sm:$0xff]  ;;  %v1219_v63 = vmul.f32 %v1218_v57, %v3418_v25 }
 0x10b   :  { %1015 = vmatpush.msrb.mxu3 %v415_v1  ;;  %948 = vmatpush.msrb.mxu0 %v215_v7  ;;  %v339_v18 = vld [vmem:[%s4247_s1 + $0x818] sm:$0xff]  ;;  %v1208_v1 = vmul.f32 %v1207_v5, %v3418_v25  ;;  %v1051_v7 = vadd.f32 0.18741608, %v1050_v58  ;;  %v653_v14 = vadd.f32 %v652_v56, %v630_v2  ;;  %v1428_v56 = vld [vmem:[%s4249_s3 + $0x190] sm:$0xff] }
 0x10c   :  { %970 = vmatpush.msrb.mxu1 %v283_v8  ;;  %v407_v29 = vld [vmem:[%s4247_s1 + $0xa38] sm:$0xff]  ;;  %994 = vmatpush.msrb.mxu2 %v343_v12  ;;  %2026 = vrcp.f32 %v3463_v11  ;;  %v1220_v4 = vadd.f32 0.112945676, %v1219_v63  ;;  %v1394_v8 = vld [vmem:[%s4249_s3 + $0x80] sm:$0xff]  ;;  %v632_v10 = vpop.f32.mrf.mxu2  ;;  %v1440_v12 = vld [vmem:[%s4249_s3 + $0x1f0] sm:$0xff]  ;;  %vm1070_vm1 = vweird.f32 %v3463_v11 }
 0x10d   :  { %1016 = vmatpush.msrb.mxu3 %v411_v24  ;;  %949 = vmatpush.msrb.mxu0 %v211_v15  ;;  %v275_v21 = vld [vmem:[%s4247_s1 + $0x618] sm:$0xff]  ;;  %v1209_v13 = vadd.f32 0.05243302, %v1208_v1  ;;  %v1392_v15 = vld [vmem:[%s4249_s3 + $0x70] sm:$0xff]  ;;  %v1052_v30 = vmul.f32 %v1051_v7, %v3360_v59  ;;  %v633_v34 = vadd.f32 %v632_v10, %v467_v6  ;;  %v1426_v63 = vld [vmem:[%s4249_s3 + $0x180] sm:$0xff]  ;;  %v1026_v10 = vmul.f32 0.5, %v3317_v55 }
 0x10e   :  { %971 = vmatpush.msrb.mxu1 %v279_v16  ;;  %v403_v22 = vld [vmem:[%s4247_s1 + $0xa18] sm:$0xff]  ;;  %995 = vmatpush.msrb.mxu2 %v339_v18  ;;  %v1221_v24 = vmul.f32 %v1220_v4, %v3418_v25  ;;  %v1438_v18 = vld [vmem:[%s4249_s3 + $0x1e0] sm:$0xff]  ;;  %v1388_v59 = vld [vmem:[%s4249_s3 + $0x50] sm:$0xff]  ;;  %s2089_s1 = smov [#allocation3]  }
 0x10f   :  { %1017 = vmatpush.msrb.mxu3 %v407_v29  ;;  %950 = vmatmul.f32.vlgmr.msrb.gmra.mxu0 %v2054_v26  ;;  %v2056_v33 = vld [vmem:[%s4246_s0 + $0x18] sm:$0xff]  ;;  %v1210_v26 = vmul.f32 %v1209_v13, %v3418_v25  ;;  %v1053_v32 = vadd.f32 1.1283791, %v1052_v30  ;;  %v1422_v55 = vld [vmem:[%s4249_s3 + $0x160] sm:$0xff] }
 0x110   :  { %996 = vmatmul.f32.vlgmr.msrb.gmra.mxu2 %v2055_v27  ;;  %972 = vmatpush.msrb.mxu1 %v275_v21  ;;  %v2060_v60 = vld [vmem:[%s4246_s0 + $0x198] sm:$0xff]  ;;  %v655_v16 = vpop.f32.mrf.mxu3  ;;  %v1222_v29 = vadd.f32 0.4994258, %v1221_v24  ;;  %s1960_s0 = sshll.u32 %s2089_s1, 4  ;;  %s1961_s0 = int_to_ptr.vmem [resolvable:$true] %s1960_s0 }
 0x111   :  { %1018 = vmatpush.msrb.mxu3 %v403_v22  ;;  %973 = vmatmul.f32.vlgmr.msrb.gmra.mxu1 %v2056_v33  ;;  %v1074_v33 = vand.u32 2147483647, %v3463_v11  ;;  %v1211_v41 = vadd.f32 0.18741608, %v1210_v26  ;;  %v656_v51 = vadd.f32 %v655_v16, %v633_v34  ;;  %v1054_v5 = vmul.f32 %v1053_v32, %v3335_v0  ;;  %v1409_v7 = vld [vmem:[%s4249_s3 + $0xf8] sm:$0xff] }
 0x112   :  { %1019 = vmatmul.f32.vlgmr.msrb.gmra.mxu3 %v2057_v49  ;;  %1512 = vmatpush.msra.mxu0 %v1408_v31  ;;  %v2027_v19 = vpop.eup %2026  ;;  %v1223_v23 = vmul.f32 %v1222_v29, %v3418_v25  ;;  %v1434_v31 = vld [vmem:[%s4249_s3 + $0x1c0] sm:$0xff]  ;;  %v1076_v49 = vand.u32 2147483648, %v3463_v11  ;;  %v1405_v26 = vld [vmem:[%s4249_s3 + $0xd8] sm:$0xff] }
 0x113   :  { %1535 = vmatpush.msra.mxu1 %v1440_v12  ;;  %v1066_v21 = vmul.f32 %v2027_v19, %v3463_v11  ;;  %vm1071_vm0 = vweird.f32 %v2027_v19  ;;  %vm1075_vm3 = vcmp.eq.f32.partialorder %v1074_v33, 8.507059e+37  ;;  %v1212_v58 = vmul.f32 %v1211_v41, %v3418_v25  ;;  %v1380_v11 = vld [vmem:[%s4249_s3 + $0x10] sm:$0xff]  ;;  %v1378_v25 = vld [vmem:[%s4249_s3] sm:$0xff] }
 0x114   :  { %1513 = vmatpush.msra.mxu0 %v1406_v36  ;;  %v3509_v44 = vadd.f32 1.0, %v1223_v23  ;;  %vm1072_vm2 = vmor %vm1070_vm1, %vm1071_vm0  ;;  %v1077_v48 = vor.u32 1.1754944e-38, %v1076_v49 }
 0x115   :  { %1536 = vmatpush.msra.mxu1 %v1438_v18  ;;  %v1067_v28 = vsub.f32 1.0, %v1066_v21  ;;  %v1213_v12 = vadd.f32 1.1283791, %v1212_v58  ;;  %v1407_v18 = vld [vmem:[%s4249_s3 + $0xe8] sm:$0xff] }
 0x116   :  { %1514 = vmatpush.msra.mxu0 %v1404_v39  ;;  %2028 = vrcp.f32 %v3509_v44  ;;  %vm1230_vm4 = vweird.f32 %v3509_v44 }
 0x117   :  { %953 = vmatmul.f32.gmra.mxu0 %v2058_v52  ;;  %1537 = vmatpush.msra.mxu1 %v1436_v35  ;;  %v1068_v37 = vmul.f32 %v2027_v19, %v1067_v28  ;;  %v1382_v52 = vld [vmem:[%s4249_s3 + $0x20] sm:$0xff]  ;;  %v1403_v28 = vld [vmem:[%s4249_s3 + $0xc8] sm:$0xff] }
 0x118   :  { %999 = vmatmul.f32.gmra.mxu2 %v2059_v53  ;;  %1515 = vmatpush.msra.mxu0 %v1402_v47  ;;  %v1430_v47 = vld [vmem:[%s4249_s3 + $0x1a0] sm:$0xff] }
 0x119   :  { %976 = vmatmul.f32.gmra.mxu1 %v2060_v60  ;;  %v1069_v45 = vadd.f32 %v2027_v19, %v1068_v37 }
 0x11a   :  { %1022 = vmatmul.f32.gmra.mxu3 %v2061_v61  ;;  %1516 = vmatpush.msra.mxu0 %v1400_v54 }
 0x11b   :  { %1538 = vmatpush.msra.mxu1 %v1434_v31  ;;  %v1073_v54 = vsel %vm1072_vm2, %v2027_v19, %v1069_v45  ;;  %v1236_v19 = vand.u32 2147483648, %v3509_v44 }
 0x11c   :  { %1517 = vmatpush.msra.mxu0 %v1398_v62  ;;  %v1078_v57 = vsel %vm1075_vm3, %v1077_v48, %v1073_v54  ;;  %v3540_v60 = vpop.eup %2028  ;;  %v1399_v48 = vld [vmem:[%s4249_s3 + $0xa8] sm:$0xff]  ;;  %v1397_v54 = vld [vmem:[%s4249_s3 + $0x98] sm:$0xff] }
 0x11d   :  { %1539 = vmatpush.msra.mxu1 %v1432_v40  ;;  %v1079_v0 = vmul.f32 %v1078_v57, %v1054_v5  ;;  %v1226_v2 = vmul.f32 %v3540_v60, %v3509_v44  ;;  %vm1231_vm5 = vweird.f32 %v3540_v60  ;;  %v1237_v34 = vor.u32 1.1754944e-38, %v1236_v19  ;;  %v1435_v19 = vld [vmem:[%s4249_s3 + $0x1c8] sm:$0xff] }
 0x11e   :  { %1518 = vmatpush.msra.mxu0 %v1396_v3  ;;  %vm1232_vm6 = vmor %vm1230_vm4, %vm1231_vm5  ;;  %v1030_v57 = vmul.f32 0.5, %v3382_v9  ;;  %v1441_v9 = vld [vmem:[%s4249_s3 + $0x1f8] sm:$0xff] }
 0x11f   :  { %v675_v22 = vpop.f32.mrf.mxu0  ;;  %1540 = vmatpush.msra.mxu1 %v1430_v47  ;;  %v1978_v3 = vclamps-f32 %v1079_v0, 1.0  ;;  %v1227_v13 = vsub.f32 1.0, %v1226_v2 }
 0x120   :  { %1519 = vmatpush.msra.mxu0 %v1394_v8  ;;  %v676_v27 = vadd.f32 %v675_v22, %v653_v14  ;;  %v1424_v8 = vld [vmem:[%s4249_s3 + $0x170] sm:$0xff] }
 0x121   :  { %1541 = vmatpush.msra.mxu1 %v1428_v56  ;;  %v1362_v14 = vadd.f32 1.0, %v1978_v3  ;;  %v1228_v30 = vmul.f32 %v3540_v60, %v1227_v13  ;;  %v1412_v56 = vld [vmem:[%s4249_s3 + $0x110] sm:$0xff]  ;;  %v1391_v13 = vld [vmem:[%s4249_s3 + $0x68] sm:$0xff] }
 0x122   :  { %1520 = vmatpush.msra.mxu0 %v1392_v15 }
 0x123   :  { %1542 = vmatpush.msra.mxu1 %v1426_v63  ;;  %v3575_v21 = vmul.f32 %v1362_v14, %v1026_v10  ;;  %v1229_v31 = vadd.f32 %v3540_v60, %v1228_v30  ;;  %v1437_v14 = vld [vmem:[%s4249_s3 + $0x1d8] sm:$0xff] }
 0x124   :  { %1521 = vmatpush.msra.mxu0 %v1390_v20  ;;  %v1234_v20 = vand.u32 2147483647, %v3509_v44  ;;  %v1401_v44 = vld [vmem:[%s4249_s3 + $0xb8] sm:$0xff] }
 0x125   :  { %1543 = vmatpush.msra.mxu1 %v1424_v8  ;;  %v1233_v37 = vsel %vm1232_vm6, %v3540_v60, %v1229_v31 }
 0x126   :  { %v698_v36 = vpop.f32.mrf.mxu1  ;;  %1522 = vmatpush.msra.mxu0 %v1388_v59  ;;  %v1420_v59 = vld [vmem:[%s4249_s3 + $0x150] sm:$0xff]  ;;  %vm1235_vm7 = vcmp.eq.f32.partialorder %v1234_v20, 8.507059e+37 }
 0x127   :  { %v699_v38 = vadd.f32 %v698_v36, %v676_v27  ;;  %v721_v39 = vpop.f32.mrf.mxu2  ;;  %1544 = vmatpush.msra.mxu1 %v1422_v55  ;;  %v1214_v36 = vmul.f32 %v1213_v12, %v3400_v17  ;;  %v1238_v41 = vsel %vm1235_vm7, %v1237_v34, %v1233_v37  ;;  %v1416_v17 = vld [vmem:[%s4249_s3 + $0x130] sm:$0xff]  ;;  %v1429_v34 = vld [vmem:[%s4249_s3 + $0x198] sm:$0xff]  ;;  %v1427_v37 = vld [vmem:[%s4249_s3 + $0x188] sm:$0xff] }
 0x128   :  { %1523 = vmatpush.msra.mxu0 %v1386_v50  ;;  %v1418_v50 = vld [vmem:[%s4249_s3 + $0x140] sm:$0xff] }
 0x129   :  { %v722_v46 = vadd.f32 %v721_v39, %v699_v38  ;;  %1545 = vmatpush.msra.mxu1 %v1420_v59  ;;  %v1385_v59 = vld [vmem:[%s4249_s3 + $0x38] sm:$0xff] }
 0x12a   :  { %v744_v53 = vpop.f32.mrf.mxu3  ;;  %1524 = vmatpush.msra.mxu0 %v1384_v43  ;;  %v1239_v43 = vmul.f32 %v1238_v41, %v1214_v36  ;;  %v1381_v36 = vld [vmem:[%s4249_s3 + $0x18] sm:$0xff] }
 0x12b   :  { %v3531_v6 = vadd.f32 %v744_v53, %v722_v46  ;;  %1546 = vmatpush.msra.mxu1 %v1418_v50 }
 0x12c   :  { %1525 = vmatpush.msra.mxu0 %v1382_v52  ;;  %v1982_v52 = vclamps-f32 %v1239_v43, 1.0  ;;  %v1425_v43 = vld [vmem:[%s4249_s3 + $0x178] sm:$0xff] }
 0x12d   :  { %v3543_v61 = vmul.f32 0.70710677, %v3531_v6  ;;  %v678_v62 = vpop.f32.mrf.mxu0  ;;  %1547 = vmatpush.msra.mxu1 %v1416_v17  ;;  %v1379_v17 = vld [vmem:[%s4249_s3 + $0x8] sm:$0xff] }
 0x12e   :  { %v679_v1 = vadd.f32 %v678_v62, %v656_v51  ;;  %1526 = vmatpush.msra.mxu0 %v1380_v11  ;;  %v1414_v51 = vld [vmem:[%s4249_s3 + $0x120] sm:$0xff]  ;;  %v1366_v58 = vadd.f32 1.0, %v1982_v52  ;;  %v1395_v62 = vld [vmem:[%s4249_s3 + $0x88] sm:$0xff] }
 0x12f   :  { %v1082_v4 = vmul.f32 %v3543_v61, %v3543_v61  ;;  %1548 = vmatpush.msra.mxu1 %v1414_v51 }
 0x130   :  { %v701_v24 = vpop.f32.mrf.mxu1  ;;  %1527 = vmatpush.msra.mxu0 %v1378_v25  ;;  %v724_v29 = vpop.f32.mrf.mxu2  ;;  %v3635_v63 = vmul.f32 %v1366_v58, %v1030_v57  ;;  %v1410_v25 = vld [vmem:[%s4249_s3 + $0x100] sm:$0xff]  ;;  %v1421_v57 = vld [vmem:[%s4249_s3 + $0x158] sm:$0xff] }
 0x131   :  { %v3562_v15 = vmin.f32 %v1082_v4, 16.0  ;;  %v702_v16 = vadd.f32 %v701_v24, %v679_v1  ;;  %1528 = vmatmul.f32.vlgmr.msra.gmra.mxu0 %v3575_v21  ;;  %1549 = vmatpush.msra.mxu1 %v1412_v56  ;;  %v1393_v4 = vld [vmem:[%s4249_s3 + $0x78] sm:$0xff] }
 0x132   :  { %1604 = vmatpush.msrb.mxu0 %v1409_v7  ;;  %v1439_v7 = vld [vmem:[%s4249_s3 + $0x1e8] sm:$0xff] }
 0x133   :  { %v1084_v22 = vmul.f32 2.1237322e-06, %v3562_v15  ;;  %v1095_v35 = vmul.f32 3.8918573e-05, %v3562_v15  ;;  %v725_v23 = vadd.f32 %v724_v29, %v702_v16  ;;  %v747_v27 = vpop.f32.mrf.mxu3  ;;  %1550 = vmatpush.msra.mxu1 %v1410_v25  ;;  %v1389_v29 = vld [vmem:[%s4249_s3 + $0x58] sm:$0xff] }
 0x134   :  { %1605 = vmatpush.msrb.mxu0 %v1407_v18 }
 0x135   :  { %v1085_v32 = vadd.f32 0.00028619796, %v1084_v22  ;;  %v1096_v33 = vadd.f32 0.001143296, %v1095_v35  ;;  %v3589_v49 = vadd.f32 %v747_v27, %v725_v23  ;;  %1627 = vmatpush.msrb.mxu1 %v1441_v9  ;;  %v1387_v35 = vld [vmem:[%s4249_s3 + $0x48] sm:$0xff]  ;;  %v1433_v23 = vld [vmem:[%s4249_s3 + $0x1b8] sm:$0xff] }
 0x136   :  { %1606 = vmatpush.msrb.mxu0 %v1405_v26  ;;  %v1431_v27 = vld [vmem:[%s4249_s3 + $0x1a8] sm:$0xff]  ;;  %v1417_v9 = vld [vmem:[%s4249_s3 + $0x138] sm:$0xff] }
 0x137   :  { %v1086_v38 = vmul.f32 %v1085_v32, %v3562_v15  ;;  %v1097_v39 = vmul.f32 %v1096_v33, %v3562_v15  ;;  %v3604_v40 = vmul.f32 0.70710677, %v3589_v49  ;;  %1628 = vmatpush.msrb.mxu1 %v1439_v7  ;;  %v1383_v33 = vld [vmem:[%s4249_s3 + $0x28] sm:$0xff] }
 0x138   :  { %1607 = vmatpush.msrb.mxu0 %v1403_v28 }
 0x139   :  { %v1087_v45 = vadd.f32 0.0036580483, %v1086_v38  ;;  %v1098_v46 = vadd.f32 0.014752088, %v1097_v39  ;;  %v1242_v47 = vmul.f32 %v3604_v40, %v3604_v40  ;;  %1531 = vmatmul.f32.gmra.mxu0 %v3635_v63  ;;  %1629 = vmatpush.msrb.mxu1 %v1437_v14 }
 0x13a   :  { %1608 = vmatpush.msrb.mxu0 %v1401_v44 }
 0x13b   :  { %v1099_v53 = vmul.f32 %v1098_v46, %v3562_v15  ;;  %v3621_v5 = vmin.f32 %v1242_v47, 16.0  ;;  %v1088_v11 = vmul.f32 %v1087_v45, %v3562_v15  ;;  %1630 = vmatpush.msrb.mxu1 %v1435_v19 }
 0x13c   :  { %1609 = vmatpush.msrb.mxu0 %v1399_v48 }
 0x13d   :  { %v1100_v60 = vadd.f32 0.112945676, %v1099_v53  ;;  %v1244_v0 = vmul.f32 2.1237322e-06, %v3621_v5  ;;  %v1255_v1 = vmul.f32 3.8918573e-05, %v3621_v5  ;;  %1631 = vmatpush.msrb.mxu1 %v1433_v23 }
 0x13e   :  { %1610 = vmatpush.msrb.mxu0 %v1397_v54  ;;  %v1089_v10 = vadd.f32 0.05243302, %v1088_v11 }
 0x13f   :  { %v1101_v2 = vmul.f32 %v1100_v60, %v3562_v15  ;;  %v1245_v3 = vadd.f32 0.00028619796, %v1244_v0  ;;  %v1256_v8 = vadd.f32 0.001143296, %v1255_v1  ;;  %1632 = vmatpush.msrb.mxu1 %v1431_v27  ;;  %v1419_v60 = vld [vmem:[%s4249_s3 + $0x148] sm:$0xff] }
 0x140   :  { %1611 = vmatpush.msrb.mxu0 %v1395_v62  ;;  %v1090_v20 = vmul.f32 %v1089_v10, %v3562_v15 }
 0x141   :  { %v1102_v12 = vadd.f32 0.4994258, %v1101_v2  ;;  %v1246_v24 = vmul.f32 %v1245_v3, %v3621_v5  ;;  %v1257_v16 = vmul.f32 %v1256_v8, %v3621_v5  ;;  %1633 = vmatpush.msrb.mxu1 %v1429_v34  ;;  %v468_v2 = vperm.slane %v3179_v42, 2  ;;  %v1470_v42 = vld [vmem:[%s4249_s3 + $0x2e0] sm:$0xff] }
 0x142   :  { %1612 = vmatpush.msrb.mxu0 %v1393_v4  ;;  %v1091_v32 = vadd.f32 0.18741608, %v1090_v20  ;;  %v1472_v4 = vld [vmem:[%s4249_s3 + $0x2f0] sm:$0xff] }
 0x143   :  { %v1103_v18 = vmul.f32 %v1102_v12, %v3562_v15  ;;  %v1247_v55 = vadd.f32 0.0036580483, %v1246_v24  ;;  %v1258_v30 = vadd.f32 0.014752088, %v1257_v16  ;;  %1634 = vmatpush.msrb.mxu1 %v1427_v37  ;;  %1558 = vmatpush.msra.mxu2 %v1472_v4  ;;  %v1468_v16 = vld [vmem:[%s4249_s3 + $0x2d0] sm:$0xff] }
 0x144   :  { %1613 = vmatpush.msrb.mxu0 %v1391_v13  ;;  %v1092_v41 = vmul.f32 %v1091_v32, %v3562_v15  ;;  %v1423_v15 = vld [vmem:[%s4249_s3 + $0x168] sm:$0xff] }
 0x145   :  { %v1104_v22 = vadd.f32 1.0, %v1103_v18  ;;  %v1259_v26 = vmul.f32 %v1258_v30, %v3621_v5  ;;  %v1248_v28 = vmul.f32 %v1247_v55, %v3621_v5  ;;  %1635 = vmatpush.msrb.mxu1 %v1425_v43  ;;  %1559 = vmatpush.msra.mxu2 %v1470_v42  ;;  %v1411_v55 = vld [vmem:[%s4249_s3 + $0x108] sm:$0xff]  ;;  %v1031_v43 = vmul.f32 0.5, %v3589_v49  ;;  %v1452_v49 = vld [vmem:[%s4249_s3 + $0x250] sm:$0xff]  ;;  %v1442_v42 = vld [vmem:[%s4249_s3 + $0x200] sm:$0xff] }
 0x146   :  { %1614 = vmatpush.msrb.mxu0 %v1389_v29  ;;  %v1093_v52 = vadd.f32 1.1283791, %v1092_v41  ;;  %v1458_v41 = vld [vmem:[%s4249_s3 + $0x280] sm:$0xff] }
 0x147   :  { %2030 = vrcp.f32 %v1104_v22  ;;  %v1260_v31 = vadd.f32 0.112945676, %v1259_v26  ;;  %v1249_v38 = vadd.f32 0.05243302, %v1248_v28  ;;  %v1116_v53 = vand.u32 2147483648, %v1104_v22  ;;  %1636 = vmatpush.msrb.mxu1 %v1423_v15  ;;  %1560 = vmatpush.msra.mxu2 %v1468_v16 }
 0x148   :  { %1615 = vmatpush.msrb.mxu0 %v1387_v35  ;;  %v1114_v56 = vand.u32 2147483647, %v1104_v22  ;;  %vm1110_vm9 = vweird.f32 %v1104_v22  ;;  %v1094_v62 = vmul.f32 %v1093_v52, %v3543_v61  ;;  %v1415_v61 = vld [vmem:[%s4249_s3 + $0x128] sm:$0xff]  ;;  %v1454_v52 = vld [vmem:[%s4249_s3 + $0x260] sm:$0xff] }
 0x149   :  { %v1261_v50 = vmul.f32 %v1260_v31, %v3621_v5  ;;  %v1250_v48 = vmul.f32 %v1249_v38, %v3621_v5  ;;  %1637 = vmatpush.msrb.mxu1 %v1421_v57  ;;  %v1460_v38 = vld [vmem:[%s4249_s3 + $0x290] sm:$0xff] }
 0x14a   :  { %1616 = vmatpush.msrb.mxu0 %v1385_v59  ;;  %vm1115_vm11 = vcmp.eq.f32.partialorder %v1114_v56, 8.507059e+37  ;;  %v1464_v59 = vld [vmem:[%s4249_s3 + $0x2b0] sm:$0xff] }
 0x14b   :  { %v1262_v39 = vadd.f32 0.4994258, %v1261_v50  ;;  %v1251_v11 = vadd.f32 0.18741608, %v1250_v48  ;;  %1638 = vmatpush.msrb.mxu1 %v1419_v60 }
 0x14c   :  { %1617 = vmatpush.msrb.mxu0 %v1383_v33  ;;  %v1462_v33 = vld [vmem:[%s4249_s3 + $0x2a0] sm:$0xff] }
 0x14d   :  { %v2031_v44 = vpop.eup %2030  ;;  %v1263_v46 = vmul.f32 %v1262_v39, %v3621_v5  ;;  %v1252_v10 = vmul.f32 %v1251_v11, %v3621_v5  ;;  %1639 = vmatpush.msrb.mxu1 %v1417_v9  ;;  %v1413_v5 = vld [vmem:[%s4249_s3 + $0x118] sm:$0xff] }
 0x14e   :  { %v1106_v45 = vmul.f32 %v2031_v44, %v1104_v22  ;;  %1618 = vmatpush.msrb.mxu0 %v1381_v36  ;;  %vm1111_vm8 = vweird.f32 %v2031_v44 }
 0x14f   :  { %v3707_v51 = vadd.f32 1.0, %v1263_v46  ;;  %vm1112_vm10 = vmor %vm1110_vm9, %vm1111_vm8  ;;  %1640 = vmatpush.msrb.mxu1 %v1415_v61  ;;  %v1253_v29 = vadd.f32 1.1283791, %v1252_v10  ;;  %v1456_v46 = vld [vmem:[%s4249_s3 + $0x270] sm:$0xff] }
 0x150   :  { %v1107_v47 = vsub.f32 1.0, %v1106_v45  ;;  %1619 = vmatpush.msrb.mxu0 %v1379_v17 }
 0x151   :  { %1620 = vmatmul.f32.vlgmr.msrb.gmra.mxu0 %v3575_v21  ;;  %2032 = vrcp.f32 %v3707_v51  ;;  %v1117_v21 = vor.u32 1.1754944e-38, %v1116_v53  ;;  %v1276_v19 = vand.u32 2147483648, %v3707_v51  ;;  %1641 = vmatpush.msrb.mxu1 %v1413_v5  ;;  %vm1270_vm12 = vweird.f32 %v3707_v51  ;;  %v1473_v5 = vld [vmem:[%s4249_s3 + $0x2f8] sm:$0xff] }
 0x152   :  { %v1108_v54 = vmul.f32 %v2031_v44, %v1107_v47  ;;  %v1274_v20 = vand.u32 2147483647, %v3707_v51  ;;  %v1254_v28 = vmul.f32 %v1253_v29, %v3604_v40 }
 0x153   :  { %1642 = vmatpush.msrb.mxu1 %v1411_v55  ;;  %v1277_v27 = vor.u32 1.1754944e-38, %v1276_v19  ;;  %v1469_v55 = vld [vmem:[%s4249_s3 + $0x2d8] sm:$0xff] }
 0x154   :  { %v1109_v58 = vadd.f32 %v2031_v44, %v1108_v54  ;;  %v767_v0 = vpop.f32.mrf.mxu0  ;;  %vm1275_vm15 = vcmp.eq.f32.partialorder %v1274_v20, 8.507059e+37 }
 0x155   :  { %v768_v13 = vadd.f32 %v767_v0, %v468_v2 }
 0x156   :  { %v1113_v25 = vsel %vm1112_vm10, %v2031_v44, %v1109_v58  ;;  %v1450_v58 = vld [vmem:[%s4249_s3 + $0x240] sm:$0xff] }
 0x157   :  { %v1118_v1 = vsel %vm1115_vm11, %v1117_v21, %v1113_v25  ;;  %v790_v3 = vpop.f32.mrf.mxu1  ;;  %v2033_v7 = vpop.eup %2032  ;;  %v1448_v21 = vld [vmem:[%s4249_s3 + $0x230] sm:$0xff]  ;;  %v1446_v25 = vld [vmem:[%s4249_s3 + $0x220] sm:$0xff] }
 0x158   :  { %v1119_v8 = vmul.f32 %v1118_v1, %v1094_v62  ;;  %v1266_v12 = vmul.f32 %v2033_v7, %v3707_v51  ;;  %vm1271_vm13 = vweird.f32 %v2033_v7  ;;  %v791_v23 = vadd.f32 %v790_v3, %v768_v13  ;;  %v1444_v3 = vld [vmem:[%s4249_s3 + $0x210] sm:$0xff] }
 0x159   :  { %1623 = vmatmul.f32.gmra.mxu0 %v3635_v63  ;;  %v1027_v63 = vmul.f32 0.5, %v3531_v6  ;;  %v1466_v6 = vld [vmem:[%s4249_s3 + $0x2c0] sm:$0xff]  ;;  %vm1272_vm14 = vmor %vm1270_vm12, %vm1271_vm13 }
 0x15a   :  { %v1979_v24 = vclamps-f32 %v1119_v8, 1.0  ;;  %v1267_v14 = vsub.f32 1.0, %v1266_v12  ;;  %1561 = vmatpush.msra.mxu2 %v1466_v6  ;;  %v1504_v6 = vld [vmem:[%s4249_s3 + $0x3f0] sm:$0xff] }
 0x15b   :  { %1581 = vmatpush.msra.mxu3 %v1504_v6 }
 0x15c   :  { %v1363_v18 = vadd.f32 1.0, %v1979_v24  ;;  %v1268_v30 = vmul.f32 %v2033_v7, %v1267_v14  ;;  %1562 = vmatpush.msra.mxu2 %v1464_v59 }
 0x15e   :  { %v1371_v22 = vmul.f32 %v1363_v18, %v1027_v63  ;;  %v770_v35 = vpop.f32.mrf.mxu0  ;;  %v1269_v26 = vadd.f32 %v2033_v7, %v1268_v30  ;;  %1563 = vmatpush.msra.mxu2 %v1462_v33  ;;  %v1471_v63 = vld [vmem:[%s4249_s3 + $0x2e8] sm:$0xff] }
 0x15f   :  { %v771_v39 = vadd.f32 %v770_v35, %v468_v2 }
 0x160   :  { %1551 = vmatmul.f32.vlgmr.msra.gmra.mxu1 %v1371_v22  ;;  %v1273_v32 = vsel %vm1272_vm14, %v2033_v7, %v1269_v26  ;;  %1564 = vmatpush.msra.mxu2 %v1460_v38 }
 0x161   :  { %v793_v31 = vpop.f32.mrf.mxu1  ;;  %v813_v34 = vpop.f32.mrf.mxu2  ;;  %v1278_v50 = vsel %vm1275_vm15, %v1277_v27, %v1273_v32  ;;  %v1502_v27 = vld [vmem:[%s4249_s3 + $0x3e0] sm:$0xff] }
 0x162   :  { %v814_v36 = vadd.f32 %v813_v34, %v791_v23  ;;  %v1279_v37 = vmul.f32 %v1278_v50, %v1254_v28  ;;  %1565 = vmatpush.msra.mxu2 %v1458_v41  ;;  %v794_v48 = vadd.f32 %v793_v31, %v771_v39  ;;  %v1465_v28 = vld [vmem:[%s4249_s3 + $0x2b8] sm:$0xff]  ;;  %1582 = vmatpush.msra.mxu3 %v1502_v27  ;;  %v1500_v50 = vld [vmem:[%s4249_s3 + $0x3d0] sm:$0xff] }
 0x164   :  { %v836_v44 = vpop.f32.mrf.mxu3  ;;  %v1983_v40 = vclamps-f32 %v1279_v37, 1.0  ;;  %1566 = vmatpush.msra.mxu2 %v1456_v46  ;;  %1583 = vmatpush.msra.mxu3 %v1500_v50 }
 0x165   :  { %v837_v17 = vadd.f32 %v836_v44, %v814_v36  ;;  %v1463_v36 = vld [vmem:[%s4249_s3 + $0x2a8] sm:$0xff]  ;;  %v1498_v44 = vld [vmem:[%s4249_s3 + $0x3c0] sm:$0xff] }
 0x166   :  { %v1367_v45 = vadd.f32 1.0, %v1983_v40  ;;  %1567 = vmatpush.msra.mxu2 %v1454_v52  ;;  %v1461_v40 = vld [vmem:[%s4249_s3 + $0x298] sm:$0xff]  ;;  %1584 = vmatpush.msra.mxu3 %v1498_v44 }
 0x168   :  { %v859_v47 = vpop.f32.mrf.mxu0  ;;  %v1375_v51 = vmul.f32 %v1367_v45, %v1031_v43  ;;  %1568 = vmatpush.msra.mxu2 %v1452_v49  ;;  %v2062_v45 = vld [vmem:[%s4248_s2] sm:$0xf] }
 0x169   :  { %v860_v15 = vadd.f32 %v859_v47, %v837_v17  ;;  %v469_v46 = vperm.slane %v2062_v45, 3  ;;  %v1494_v49 = vld [vmem:[%s4249_s3 + $0x3a0] sm:$0xff] }
 0x16a   :  { %1554 = vmatmul.f32.gmra.mxu1 %v1375_v51  ;;  %1569 = vmatpush.msra.mxu2 %v1450_v58 }
 0x16b   :  { %v882_v53 = vpop.f32.mrf.mxu1  ;;  %v816_v56 = vpop.f32.mrf.mxu2 }
 0x16c   :  { %v3773_v54 = vadd.f32 %v882_v53, %v860_v15  ;;  %v817_v57 = vadd.f32 %v816_v56, %v794_v48  ;;  %1570 = vmatpush.msra.mxu2 %v1448_v21  ;;  %v1496_v48 = vld [vmem:[%s4249_s3 + $0x3b0] sm:$0xff]  ;;  %v1459_v15 = vld [vmem:[%s4249_s3 + $0x288] sm:$0xff]  ;;  %v1457_v56 = vld [vmem:[%s4249_s3 + $0x278] sm:$0xff] }
 0x16d   :  { %1585 = vmatpush.msra.mxu3 %v1496_v48  ;;  %v1492_v21 = vld [vmem:[%s4249_s3 + $0x390] sm:$0xff] }
 0x16e   :  { %v3779_v11 = vmul.f32 0.70710677, %v3773_v54  ;;  %v839_v60 = vpop.f32.mrf.mxu3  ;;  %1571 = vmatpush.msra.mxu2 %v1446_v25 }
 0x16f   :  { %v840_v62 = vadd.f32 %v839_v60, %v817_v57  ;;  %1586 = vmatpush.msra.mxu3 %v1494_v49 }
 0x170   :  { %v1122_v0 = vmul.f32 %v3779_v11, %v3779_v11  ;;  %1572 = vmatpush.msra.mxu2 %v1444_v3  ;;  %v1453_v3 = vld [vmem:[%s4249_s3 + $0x258] sm:$0xff] }
 0x171   :  { %v862_v1 = vpop.f32.mrf.mxu0  ;;  %1587 = vmatpush.msra.mxu3 %v1492_v21  ;;  %v1028_v21 = vmul.f32 0.5, %v3773_v54 }
 0x172   :  { %v3789_v9 = vmin.f32 %v1122_v0, 16.0  ;;  %v863_v2 = vadd.f32 %v862_v1, %v840_v62  ;;  %1643 = vmatmul.f32.vlgmr.msrb.gmra.mxu1 %v1371_v22  ;;  %1573 = vmatpush.msra.mxu2 %v1442_v42  ;;  %v1467_v22 = vld [vmem:[%s4249_s3 + $0x2c8] sm:$0xff]  ;;  %v1488_v42 = vld [vmem:[%s4249_s3 + $0x370] sm:$0xff] }
 0x173   :  { %v1455_v0 = vld [vmem:[%s4249_s3 + $0x268] sm:$0xff] }
 0x174   :  { %v1124_v4 = vmul.f32 2.1237322e-06, %v3789_v9  ;;  %v1135_v7 = vmul.f32 3.8918573e-05, %v3789_v9  ;;  %v885_v8 = vpop.f32.mrf.mxu1  ;;  %1650 = vmatpush.msrb.mxu2 %v1473_v5  ;;  %v1451_v5 = vld [vmem:[%s4249_s3 + $0x248] sm:$0xff] }
 0x175   :  { %v3796_v10 = vadd.f32 %v885_v8, %v863_v2  ;;  %v1490_v2 = vld [vmem:[%s4249_s3 + $0x380] sm:$0xff] }
 0x176   :  { %v1125_v61 = vadd.f32 0.00028619796, %v1124_v4  ;;  %v1136_v12 = vadd.f32 0.001143296, %v1135_v7  ;;  %1651 = vmatpush.msrb.mxu2 %v1471_v63  ;;  %1588 = vmatpush.msra.mxu3 %v1490_v2 }
 0x177   :  { %v3802_v24 = vmul.f32 0.70710677, %v3796_v10 }
 0x178   :  { %v1126_v13 = vmul.f32 %v1125_v61, %v3789_v9  ;;  %v1137_v14 = vmul.f32 %v1136_v12, %v3789_v9  ;;  %1652 = vmatpush.msrb.mxu2 %v1469_v55  ;;  %1589 = vmatpush.msra.mxu3 %v1488_v42  ;;  %v1486_v55 = vld [vmem:[%s4249_s3 + $0x360] sm:$0xff] }
 0x179   :  { %v1282_v16 = vmul.f32 %v3802_v24, %v3802_v24 }
 0x17a   :  { %v1138_v18 = vadd.f32 0.014752088, %v1137_v14  ;;  %v1127_v29 = vadd.f32 0.0036580483, %v1126_v13  ;;  %1646 = vmatmul.f32.gmra.mxu1 %v1375_v51  ;;  %1653 = vmatpush.msrb.mxu2 %v1467_v22 }
 0x17b   :  { %v3814_v19 = vmin.f32 %v1282_v16, 16.0  ;;  %1590 = vmatpush.msra.mxu3 %v1486_v55 }
 0x17c   :  { %v1139_v30 = vmul.f32 %v1138_v18, %v3789_v9  ;;  %v1128_v26 = vmul.f32 %v1127_v29, %v3789_v9  ;;  %1654 = vmatpush.msrb.mxu2 %v1465_v28 }
 0x17d   :  { %v1284_v20 = vmul.f32 2.1237322e-06, %v3814_v19  ;;  %v1295_v35 = vmul.f32 3.8918573e-05, %v3814_v19 }
 0x17e   :  { %v1140_v23 = vadd.f32 0.112945676, %v1139_v30  ;;  %1655 = vmatpush.msrb.mxu2 %v1463_v36  ;;  %v1129_v39 = vadd.f32 0.05243302, %v1128_v26  ;;  %v1449_v30 = vld [vmem:[%s4249_s3 + $0x238] sm:$0xff] }
 0x17f   :  { %v1285_v59 = vadd.f32 0.00028619796, %v1284_v20  ;;  %v1296_v31 = vadd.f32 0.001143296, %v1295_v35 }
 0x180   :  { %v1141_v32 = vmul.f32 %v1140_v23, %v3789_v9  ;;  %v905_v34 = vpop.f32.mrf.mxu2  ;;  %1656 = vmatpush.msrb.mxu2 %v1461_v40  ;;  %v1130_v53 = vmul.f32 %v1129_v39, %v3789_v9  ;;  %v1447_v23 = vld [vmem:[%s4249_s3 + $0x228] sm:$0xff]  ;;  %v1480_v40 = vld [vmem:[%s4249_s3 + $0x330] sm:$0xff] }
 0x181   :  { %v1286_v33 = vmul.f32 %v1285_v59, %v3814_v19  ;;  %v1297_v37 = vmul.f32 %v1296_v31, %v3814_v19  ;;  %v906_v60 = vadd.f32 %v905_v34, %v469_v46  ;;  %v1445_v34 = vld [vmem:[%s4249_s3 + $0x218] sm:$0xff] }
 0x182   :  { %v1142_v38 = vadd.f32 0.4994258, %v1141_v32  ;;  %1657 = vmatpush.msrb.mxu2 %v1459_v15  ;;  %v1131_v1 = vadd.f32 0.18741608, %v1130_v53  ;;  %v1478_v15 = vld [vmem:[%s4249_s3 + $0x320] sm:$0xff] }
 0x183   :  { %v1298_v41 = vadd.f32 0.014752088, %v1297_v37  ;;  %v1287_v43 = vadd.f32 0.0036580483, %v1286_v33  ;;  %v928_v47 = vpop.f32.mrf.mxu3  ;;  %v1482_v33 = vld [vmem:[%s4249_s3 + $0x340] sm:$0xff] }
 0x184   :  { %v1143_v17 = vmul.f32 %v1142_v38, %v3789_v9  ;;  %1658 = vmatpush.msrb.mxu2 %v1457_v56  ;;  %v929_v7 = vadd.f32 %v928_v47, %v906_v60  ;;  %v1132_v63 = vmul.f32 %v1131_v1, %v3789_v9  ;;  %v1484_v9 = vld [vmem:[%s4249_s3 + $0x350] sm:$0xff] }
 0x185   :  { %v1299_v51 = vmul.f32 %v1298_v41, %v3814_v19  ;;  %v1288_v58 = vmul.f32 %v1287_v43, %v3814_v19  ;;  %1591 = vmatpush.msra.mxu3 %v1484_v9  ;;  %v1443_v41 = vld [vmem:[%s4249_s3 + $0x208] sm:$0xff] }
 0x186   :  { %v3861_v52 = vadd.f32 1.0, %v1143_v17  ;;  %1659 = vmatpush.msrb.mxu2 %v1455_v0  ;;  %v1133_v27 = vadd.f32 1.1283791, %v1132_v63 }
 0x187   :  { %v1300_v57 = vadd.f32 0.112945676, %v1299_v51  ;;  %v1289_v4 = vadd.f32 0.05243302, %v1288_v58  ;;  %1592 = vmatpush.msra.mxu3 %v1482_v33 }
 0x188   :  { %2034 = vrcp.f32 %v3861_v52  ;;  %1660 = vmatpush.msrb.mxu2 %v1453_v3  ;;  %v1156_v26 = vand.u32 2147483648, %v3861_v52  ;;  %v1154_v31 = vand.u32 2147483647, %v3861_v52  ;;  %vm1150_vm1 = vweird.f32 %v3861_v52 }
 0x189   :  { %v1301_v62 = vmul.f32 %v1300_v57, %v3814_v19  ;;  %v908_v25 = vpop.f32.mrf.mxu2  ;;  %v1290_v20 = vmul.f32 %v1289_v4, %v3814_v19  ;;  %1593 = vmatpush.msra.mxu3 %v1480_v40  ;;  %v1493_v40 = vld [vmem:[%s4249_s3 + $0x398] sm:$0xff] }
 0x18a   :  { %1661 = vmatpush.msrb.mxu2 %v1451_v5  ;;  %v909_v6 = vadd.f32 %v908_v25, %v469_v46  ;;  %v1157_v17 = vor.u32 1.1754944e-38, %v1156_v26  ;;  %v1134_v46 = vmul.f32 %v1133_v27, %v3779_v11  ;;  %vm1155_vm3 = vcmp.eq.f32.partialorder %v1154_v31, 8.507059e+37  ;;  %v1476_v11 = vld [vmem:[%s4249_s3 + $0x310] sm:$0xff]  ;;  %v1474_v25 = vld [vmem:[%s4249_s3 + $0x300] sm:$0xff]  ;;  %v1499_v26 = vld [vmem:[%s4249_s3 + $0x3c8] sm:$0xff] }
 0x18b   :  { %v1302_v8 = vadd.f32 0.4994258, %v1301_v62  ;;  %v1291_v50 = vadd.f32 0.18741608, %v1290_v20  ;;  %1594 = vmatpush.msra.mxu3 %v1478_v15  ;;  %v1489_v15 = vld [vmem:[%s4249_s3 + $0x378] sm:$0xff] }
 0x18c   :  { %v931_v61 = vpop.f32.mrf.mxu3  ;;  %v951_v12 = vpop.f32.mrf.mxu0  ;;  %1662 = vmatpush.msrb.mxu2 %v1449_v30  ;;  %v1501_v30 = vld [vmem:[%s4249_s3 + $0x3d8] sm:$0xff] }
 0x18d   :  { %v952_v14 = vadd.f32 %v951_v12, %v929_v7  ;;  %v1303_v16 = vmul.f32 %v1302_v8, %v3814_v19  ;;  %v932_v36 = vadd.f32 %v931_v61, %v909_v6  ;;  %v1292_v53 = vmul.f32 %v1291_v50, %v3814_v19  ;;  %1595 = vmatpush.msra.mxu3 %v1476_v11  ;;  %v1505_v7 = vld [vmem:[%s4249_s3 + $0x3f8] sm:$0xff]  ;;  %v1495_v50 = vld [vmem:[%s4249_s3 + $0x3a8] sm:$0xff] }
 0x18e   :  { %v2035_v13 = vpop.eup %2034  ;;  %v974_v29 = vpop.f32.mrf.mxu1  ;;  %1663 = vmatpush.msrb.mxu2 %v1447_v23 }
 0x18f   :  { %v1146_v18 = vmul.f32 %v2035_v13, %v3861_v52  ;;  %v3901_v22 = vadd.f32 1.0, %v1303_v16  ;;  %v975_v59 = vadd.f32 %v974_v29, %v952_v14  ;;  %vm1151_vm0 = vweird.f32 %v2035_v13  ;;  %1596 = vmatpush.msra.mxu3 %v1474_v25  ;;  %v1503_v14 = vld [vmem:[%s4249_s3 + $0x3e8] sm:$0xff] }
 0x190   :  { %1664 = vmatpush.msrb.mxu2 %v1445_v34  ;;  %vm1152_vm2 = vmor %vm1150_vm1, %vm1151_vm0  ;;  %v1293_v1 = vadd.f32 1.1283791, %v1292_v53  ;;  %v1487_v53 = vld [vmem:[%s4249_s3 + $0x368] sm:$0xff] }
 0x191   :  { %v1147_v35 = vsub.f32 1.0, %v1146_v18  ;;  %2036 = vrcp.f32 %v3901_v22  ;;  %v1316_v4 = vand.u32 2147483648, %v3901_v22  ;;  %v1314_v12 = vand.u32 2147483647, %v3901_v22  ;;  %1673 = vmatpush.msrb.mxu3 %v1505_v7  ;;  %v1479_v7 = vld [vmem:[%s4249_s3 + $0x328] sm:$0xff] }
 0x192   :  { %1665 = vmatpush.msrb.mxu2 %v1443_v41  ;;  %vm1310_vm5 = vweird.f32 %v3901_v22  ;;  %v1294_v20 = vmul.f32 %v1293_v1, %v3802_v24 }
 0x193   :  { %v1148_v28 = vmul.f32 %v2035_v13, %v1147_v35  ;;  %v997_v32 = vpop.f32.mrf.mxu2  ;;  %1674 = vmatpush.msrb.mxu3 %v1503_v14  ;;  %v1317_v55 = vor.u32 1.1754944e-38, %v1316_v4  ;;  %vm1315_vm7 = vcmp.eq.f32.partialorder %v1314_v12, 8.507059e+37  ;;  %v1481_v4 = vld [vmem:[%s4249_s3 + $0x338] sm:$0xff]  ;;  %v1475_v14 = vld [vmem:[%s4249_s3 + $0x308] sm:$0xff] }
 0x194   :  { %v998_v37 = vadd.f32 %v997_v32, %v975_v59  ;;  %v954_v39 = vpop.f32.mrf.mxu0  ;;  %v1477_v12 = vld [vmem:[%s4249_s3 + $0x318] sm:$0xff] }
 0x195   :  { %v1149_v38 = vadd.f32 %v2035_v13, %v1148_v28  ;;  %v1020_v44 = vpop.f32.mrf.mxu3  ;;  %v955_v43 = vadd.f32 %v954_v39, %v932_v36  ;;  %1675 = vmatpush.msrb.mxu3 %v1501_v30  ;;  %v1497_v28 = vld [vmem:[%s4249_s3 + $0x3b8] sm:$0xff]  ;;  %v1032_v36 = vmul.f32 0.5, %v3796_v10  ;;  %v1491_v10 = vld [vmem:[%s4249_s3 + $0x388] sm:$0xff] }
 0x196   :  { %v3926_v45 = vadd.f32 %v1020_v44, %v998_v37  ;;  %v977_v48 = vpop.f32.mrf.mxu1 }
 0x197   :  { %v1153_v47 = vsel %vm1152_vm2, %v2035_v13, %v1149_v38  ;;  %v2037_v51 = vpop.eup %2036  ;;  %v978_v60 = vadd.f32 %v977_v48, %v955_v43  ;;  %1676 = vmatpush.msrb.mxu3 %v1499_v26 }
 0x198   :  { %v1158_v52 = vsel %vm1155_vm3, %v1157_v17, %v1153_v47  ;;  %v3934_v49 = vmul.f32 0.70710677, %v3926_v45  ;;  %v1306_v57 = vmul.f32 %v2037_v51, %v3901_v22  ;;  %vm1311_vm4 = vweird.f32 %v2037_v51 }
 0x199   :  { %v1159_v56 = vmul.f32 %v1158_v52, %v1134_v46  ;;  %vm1312_vm6 = vmor %vm1310_vm5, %vm1311_vm4  ;;  %1677 = vmatpush.msrb.mxu3 %v1497_v28 }
 0x19a   :  { %v1162_v58 = vmul.f32 %v3934_v49, %v3934_v49  ;;  %v1307_v62 = vsub.f32 1.0, %v1306_v57 }
 0x19b   :  { %v1980_v0 = vclamps-f32 %v1159_v56, 1.0  ;;  %v1000_v19 = vpop.f32.mrf.mxu2  ;;  %1678 = vmatpush.msrb.mxu3 %v1495_v50 }
 0x19c   :  { %v3946_v2 = vmin.f32 %v1162_v58, 16.0  ;;  %v1001_v3 = vadd.f32 %v1000_v19, %v978_v60  ;;  %v1308_v61 = vmul.f32 %v2037_v51, %v1307_v62  ;;  %v1485_v60 = vld [vmem:[%s4249_s3 + $0x358] sm:$0xff]  ;;  %v1483_v19 = vld [vmem:[%s4249_s3 + $0x348] sm:$0xff] }
 0x19d   :  { %v1364_v8 = vadd.f32 1.0, %v1980_v0  ;;  %v1023_v54 = vpop.f32.mrf.mxu3  ;;  %1679 = vmatpush.msrb.mxu3 %v1493_v40 }
 0x19e   :  { %v1164_v42 = vmul.f32 2.1237322e-06, %v3946_v2  ;;  %v1175_v5 = vmul.f32 3.8918573e-05, %v3946_v2  ;;  %v3955_v13 = vadd.f32 %v1023_v54, %v1001_v3  ;;  %v1309_v63 = vadd.f32 %v2037_v51, %v1308_v61 }
 0x19f   :  { %v3960_v16 = vmul.f32 %v1364_v8, %v1028_v21  ;;  %1680 = vmatpush.msrb.mxu3 %v1491_v10 }
 0x1a0   :  { %v1165_v18 = vadd.f32 0.00028619796, %v1164_v42  ;;  %v1176_v29 = vadd.f32 0.001143296, %v1175_v5  ;;  %v3968_v6 = vmul.f32 0.70710677, %v3955_v13  ;;  %v1313_v35 = vsel %vm1312_vm6, %v2037_v51, %v1309_v63 }
 0x1a1   :  { %1574 = vmatmul.f32.vlgmr.msra.gmra.mxu2 %v3960_v16  ;;  %v1318_v23 = vsel %vm1315_vm7, %v1317_v55, %v1313_v35  ;;  %1681 = vmatpush.msrb.mxu3 %v1489_v15 }
 0x1a2   :  { %v1166_v22 = vmul.f32 %v1165_v18, %v3946_v2  ;;  %v1177_v9 = vmul.f32 %v1176_v29, %v3946_v2  ;;  %v1322_v24 = vmul.f32 %v3968_v6, %v3968_v6  ;;  %v1319_v59 = vmul.f32 %v1318_v23, %v1294_v20 }
 0x1a3   :  { %1682 = vmatpush.msrb.mxu3 %v1487_v53 }
 0x1a4   :  { %v1178_v27 = vadd.f32 0.014752088, %v1177_v9  ;;  %v1167_v31 = vadd.f32 0.0036580483, %v1166_v22  ;;  %v3981_v32 = vmin.f32 %v1322_v24, 16.0  ;;  %v1984_v33 = vclamps-f32 %v1319_v59, 1.0 }
 0x1a5   :  { %1683 = vmatpush.msrb.mxu3 %v1485_v60 }
 0x1a6   :  { %v1179_v34 = vmul.f32 %v1178_v27, %v3946_v2  ;;  %v1324_v37 = vmul.f32 2.1237322e-06, %v3981_v32  ;;  %v1368_v38 = vadd.f32 1.0, %v1984_v33  ;;  %v1335_v39 = vmul.f32 3.8918573e-05, %v3981_v32 }
 0x1a7   :  { %v1168_v41 = vmul.f32 %v1167_v31, %v3946_v2  ;;  %1684 = vmatpush.msrb.mxu3 %v1483_v19 }
 0x1a8   :  { %v1180_v44 = vadd.f32 0.112945676, %v1179_v34  ;;  %v1325_v17 = vadd.f32 0.00028619796, %v1324_v37  ;;  %v1376_v43 = vmul.f32 %v1368_v38, %v1032_v36  ;;  %v1336_v46 = vadd.f32 0.001143296, %v1335_v39 }
 0x1a9   :  { %v1169_v56 = vadd.f32 0.05243302, %v1168_v41  ;;  %1685 = vmatpush.msrb.mxu3 %v1481_v4  ;;  %v1884_v4 = vld [vmem:[%s4251_s5 + $0x60] sm:$0xff] }
 0x1aa   :  { %v1181_v47 = vmul.f32 %v1180_v44, %v3946_v2  ;;  %v1326_v48 = vmul.f32 %v1325_v17, %v3981_v32  ;;  %1577 = vmatmul.f32.gmra.mxu2 %v1376_v43  ;;  %v1337_v51 = vmul.f32 %v1336_v46, %v3981_v32  ;;  %v1029_v44 = vmul.f32 0.5, %v3926_v45  ;;  %v4041_v45 = vld [vmem:[%s4250_s4] sm:$0x3] }
 0x1ab   :  { %v1170_v62 = vmul.f32 %v1169_v56, %v3946_v2  ;;  %1686 = vmatpush.msrb.mxu3 %v1479_v7  ;;  %v1508_v53 = vperm.slane %v4041_v45, 0 }
 0x1ac   :  { %v1182_v52 = vadd.f32 0.4994258, %v1181_v47  ;;  %v1338_v57 = vadd.f32 0.014752088, %v1337_v51  ;;  %v1327_v58 = vadd.f32 0.0036580483, %v1326_v48 }
 0x1ad   :  { %v1171_v8 = vadd.f32 0.18741608, %v1170_v62  ;;  %1687 = vmatpush.msrb.mxu3 %v1477_v12  ;;  %v1033_v48 = vmul.f32 0.5, %v3955_v13  ;;  %v1887_v13 = vld [vmem:[%s4251_s5 + $0x78] sm:$0xff] }
 0x1ae   :  { %v1183_v11 = vmul.f32 %v1182_v52, %v3946_v2  ;;  %v1339_v21 = vmul.f32 %v1338_v57, %v3981_v32  ;;  %v1328_v1 = vmul.f32 %v1327_v58, %v3981_v32  ;;  %v1529_v52 = vpop.f32.mrf.mxu0  ;;  %1908 = vmatpush.msra.mxu0 %v1887_v13  ;;  %1990 = vmatpush.msra.mxu2 %v1887_v13  ;;  %v1899_v13 = vld [vmem:[%s4251_s5 + $0xd8] sm:$0xff] }
 0x1af   :  { %1688 = vmatpush.msrb.mxu3 %v1475_v14  ;;  %v1530_v57 = vadd.f32 %v1529_v52, %v1508_v53 }
 0x1b0   :  { %v1184_v0 = vadd.f32 1.0, %v1183_v11  ;;  %v1340_v25 = vadd.f32 0.112945676, %v1339_v21  ;;  %v1329_v61 = vadd.f32 0.05243302, %v1328_v1  ;;  %v1886_v21 = vld [vmem:[%s4251_s5 + $0x70] sm:$0xff] }
 0x1b1   :  { %1909 = vmatpush.msra.mxu0 %v1886_v21  ;;  %1991 = vmatpush.msra.mxu2 %v1886_v21 }
 0x1b2   :  { %2038 = vrcp.f32 %v1184_v0  ;;  %1666 = vmatmul.f32.vlgmr.msrb.gmra.mxu2 %v3960_v16  ;;  %v1341_v3 = vmul.f32 %v1340_v25, %v3981_v32  ;;  %v1172_v16 = vmul.f32 %v1171_v8, %v3946_v2  ;;  %v1330_v29 = vmul.f32 %v1329_v61, %v3981_v32  ;;  %v1885_v25 = vld [vmem:[%s4251_s5 + $0x68] sm:$0xff] }
 0x1b3   :  { %v1196_v30 = vand.u32 2147483648, %v1184_v0  ;;  %v1194_v22 = vand.u32 2147483647, %v1184_v0  ;;  %vm1190_vm9 = vweird.f32 %v1184_v0  ;;  %1910 = vmatpush.msra.mxu0 %v1885_v25  ;;  %1992 = vmatpush.msra.mxu2 %v1885_v25 }
 0x1b4   :  { %v1342_v54 = vadd.f32 0.4994258, %v1341_v3  ;;  %v1173_v20 = vadd.f32 1.1283791, %v1172_v16  ;;  %v1331_v9 = vadd.f32 0.18741608, %v1330_v29 }
 0x1b5   :  { %v1197_v26 = vor.u32 1.1754944e-38, %v1196_v30  ;;  %vm1195_vm11 = vcmp.eq.f32.partialorder %v1194_v22, 8.507059e+37  ;;  %1911 = vmatpush.msra.mxu0 %v1884_v4  ;;  %1993 = vmatpush.msra.mxu2 %v1884_v4  ;;  %v1898_v4 = vld [vmem:[%s4251_s5 + $0xd0] sm:$0xff] }
 0x1b6   :  { %v1343_v42 = vmul.f32 %v1342_v54, %v3981_v32  ;;  %v1174_v24 = vmul.f32 %v1173_v20, %v3934_v49  ;;  %v1332_v28 = vmul.f32 %v1331_v9, %v3981_v32  ;;  %v1532_v58 = vpop.f32.mrf.mxu0  ;;  %v1883_v54 = vld [vmem:[%s4251_s5 + $0x58] sm:$0xff]  ;;  %v1880_v9 = vld [vmem:[%s4251_s5 + $0x40] sm:$0xff] }
 0x1b7   :  { %v1533_v7 = vadd.f32 %v1532_v58, %v1508_v53  ;;  %1912 = vmatpush.msra.mxu0 %v1883_v54  ;;  %1994 = vmatpush.msra.mxu2 %v1883_v54 }
 0x1b8   :  { %v2039_v5 = vpop.eup %2038  ;;  %v1344_v18 = vadd.f32 1.0, %v1343_v42  ;;  %v1333_v37 = vadd.f32 1.1283791, %v1332_v28  ;;  %v1882_v42 = vld [vmem:[%s4251_s5 + $0x50] sm:$0xff]  ;;  %v1903_v28 = vld [vmem:[%s4251_s5 + $0xf8] sm:$0xff] }
 0x1b9   :  { %v1186_v63 = vmul.f32 %v2039_v5, %v1184_v0  ;;  %vm1191_vm8 = vweird.f32 %v2039_v5  ;;  %1913 = vmatpush.msra.mxu0 %v1882_v42  ;;  %1995 = vmatpush.msra.mxu2 %v1882_v42 }
 0x1ba   :  { %1669 = vmatmul.f32.gmra.mxu2 %v1376_v43  ;;  %2040 = vrcp.f32 %v1344_v18  ;;  %vm1192_vm10 = vmor %vm1190_vm9, %vm1191_vm8  ;;  %v1356_v36 = vand.u32 2147483648, %v1344_v18  ;;  %v1354_v39 = vand.u32 2147483647, %v1344_v18  ;;  %vm1350_vm13 = vweird.f32 %v1344_v18  ;;  %1931 = vmatpush.msra.mxu1 %v1903_v28 }
 0x1bb   :  { %v1187_v55 = vsub.f32 1.0, %v1186_v63  ;;  %v1334_v43 = vmul.f32 %v1333_v37, %v3968_v6  ;;  %v1902_v37 = vld [vmem:[%s4251_s5 + $0xf0] sm:$0xff] }
 0x1bc   :  { %v1357_v17 = vor.u32 1.1754944e-38, %v1356_v36  ;;  %vm1355_vm15 = vcmp.eq.f32.partialorder %v1354_v39, 8.507059e+37  ;;  %v1878_v36 = vld [vmem:[%s4251_s5 + $0x30] sm:$0xff]  ;;  %1932 = vmatpush.msra.mxu1 %v1902_v37 }
 0x1bd   :  { %v1188_v35 = vmul.f32 %v2039_v5, %v1187_v55  ;;  %v1881_v55 = vld [vmem:[%s4251_s5 + $0x48] sm:$0xff] }
 0x1be   :  { %1914 = vmatpush.msra.mxu0 %v1881_v55  ;;  %1996 = vmatpush.msra.mxu2 %v1881_v55 }
 0x1bf   :  { %v1189_v23 = vadd.f32 %v2039_v5, %v1188_v35 }
 0x1c0   :  { %v2041_v2 = vpop.eup %2040  ;;  %1915 = vmatpush.msra.mxu0 %v1880_v9  ;;  %1997 = vmatpush.msra.mxu2 %v1880_v9 }
 0x1c1   :  { %v1193_v59 = vsel %vm1192_vm10, %v2039_v5, %v1189_v23  ;;  %v1346_v31 = vmul.f32 %v2041_v2, %v1344_v18  ;;  %vm1351_vm12 = vweird.f32 %v2041_v2  ;;  %v1509_v5 = vperm.slane %v4041_v45, 1 }
 0x1c2   :  { %v1198_v27 = vsel %vm1195_vm11, %v1197_v26, %v1193_v59  ;;  %vm1352_vm14 = vmor %vm1350_vm13, %vm1351_vm12 }
 0x1c3   :  { %v1199_v33 = vmul.f32 %v1198_v27, %v1174_v24  ;;  %v1347_v34 = vsub.f32 1.0, %v1346_v31  ;;  %v1879_v27 = vld [vmem:[%s4251_s5 + $0x38] sm:$0xff] }
 0x1c4   :  { %1916 = vmatpush.msra.mxu0 %v1879_v27  ;;  %1998 = vmatpush.msra.mxu2 %v1879_v27 }
 0x1c5   :  { %v1981_v50 = vclamps-f32 %v1199_v33, 1.0  ;;  %v1348_v38 = vmul.f32 %v2041_v2, %v1347_v34 }
 0x1c6   :  { %1917 = vmatpush.msra.mxu0 %v1878_v36  ;;  %1999 = vmatpush.msra.mxu2 %v1878_v36  ;;  %v1894_v36 = vld [vmem:[%s4251_s5 + $0xb0] sm:$0xff] }
 0x1c7   :  { %v1365_v40 = vadd.f32 1.0, %v1981_v50  ;;  %v1349_v41 = vadd.f32 %v2041_v2, %v1348_v38 }
 0x1c9   :  { %v1373_v49 = vmul.f32 %v1365_v40, %v1029_v44  ;;  %v1353_v32 = vsel %vm1352_vm14, %v2041_v2, %v1349_v41  ;;  %v1877_v41 = vld [vmem:[%s4251_s5 + $0x28] sm:$0xff] }
 0x1ca   :  { %v1358_v10 = vsel %vm1355_vm15, %v1357_v17, %v1353_v32  ;;  %1918 = vmatpush.msra.mxu0 %v1877_v41  ;;  %2000 = vmatpush.msra.mxu2 %v1877_v41 }
 0x1cb   :  { %1597 = vmatmul.f32.vlgmr.msra.gmra.mxu3 %v1373_v49  ;;  %v1359_v46 = vmul.f32 %v1358_v10, %v1334_v43 }
 0x1cc   :  { %2006 = vmatpush.msra.mxu3 %v1903_v28 }
 0x1cd   :  { %v1985_v47 = vclamps-f32 %v1359_v46, 1.0 }
 0x1ce   :  { %v1621_v14 = vpop.f32.mrf.mxu0  ;;  %2007 = vmatpush.msra.mxu3 %v1902_v37 }
 0x1cf   :  { %v1369_v15 = vadd.f32 1.0, %v1985_v47  ;;  %v1622_v23 = vadd.f32 %v1621_v14, %v1509_v5  ;;  %v1873_v14 = vld [vmem:[%s4251_s5 + $0x8] sm:$0xff] }
 0x1d1   :  { %v1377_v51 = vmul.f32 %v1369_v15, %v1033_v48  ;;  %v1876_v48 = vld [vmem:[%s4251_s5 + $0x20] sm:$0xff] }
 0x1d2   :  { %v1900_v15 = vld [vmem:[%s4251_s5 + $0xe0] sm:$0xff]  ;;  %1919 = vmatpush.msra.mxu0 %v1876_v48  ;;  %2001 = vmatpush.msra.mxu2 %v1876_v48 }
 0x1d3   :  { %1600 = vmatmul.f32.gmra.mxu3 %v1377_v51 }
 0x1d6   :  { %v1624_v17 = vpop.f32.mrf.mxu0 }
 0x1db   :  { %1689 = vmatmul.f32.vlgmr.msrb.gmra.mxu3 %v1373_v49  ;;  %v1901_v49 = vld [vmem:[%s4251_s5 + $0xe8] sm:$0xff] }
 0x1dc   :  { %1933 = vmatpush.msra.mxu1 %v1901_v49  ;;  %2008 = vmatpush.msra.mxu3 %v1901_v49 }
 0x1dd   :  { %v1552_v6 = vpop.f32.mrf.mxu1 }
 0x1de   :  { %v1553_v11 = vadd.f32 %v1552_v6, %v1530_v57  ;;  %1934 = vmatpush.msra.mxu1 %v1900_v15  ;;  %v1625_v6 = vadd.f32 %v1624_v17, %v1509_v5  ;;  %v1875_v57 = vld [vmem:[%s4251_s5 + $0x18] sm:$0xff]  ;;  %2009 = vmatpush.msra.mxu3 %v1900_v15 }
 0x1df   :  { %1920 = vmatpush.msra.mxu0 %v1875_v57  ;;  %2002 = vmatpush.msra.mxu2 %v1875_v57 }
 0x1e0   :  { %1935 = vmatpush.msra.mxu1 %v1899_v13  ;;  %2010 = vmatpush.msra.mxu3 %v1899_v13 }
 0x1e2   :  { %1936 = vmatpush.msra.mxu1 %v1898_v4  ;;  %2011 = vmatpush.msra.mxu3 %v1898_v4  ;;  %v1889_v4 = vld [vmem:[%s4251_s5 + $0x88] sm:$0xff] }
 0x1e3   :  { %1692 = vmatmul.f32.gmra.mxu3 %v1377_v51 }
 0x1e7   :  { %v1555_v0 = vpop.f32.mrf.mxu1 }
 0x1e8   :  { %v1556_v61 = vadd.f32 %v1555_v0, %v1533_v7 }
 0x1ef   :  { %v1644_v30 = vpop.f32.mrf.mxu1 }
 0x1f0   :  { %v1645_v31 = vadd.f32 %v1644_v30, %v1622_v23 }
 0x1f7   :  { %v1647_v51 = vpop.f32.mrf.mxu1 }
 0x1f8   :  { %v1648_v0 = vadd.f32 %v1647_v51, %v1625_v6  ;;  %v1891_v6 = vld [vmem:[%s4251_s5 + $0x98] sm:$0xff] }
 0x224   :  { %v1575_v56 = vpop.f32.mrf.mxu2 }
 0x225   :  { %v1576_v60 = vadd.f32 %v1575_v56, %v1553_v11 }
 0x22d   :  { %v1578_v1 = vpop.f32.mrf.mxu2 }
 0x22e   :  { %v1579_v16 = vadd.f32 %v1578_v1, %v1556_v61  ;;  %v1874_v1 = vld [vmem:[%s4251_s5 + $0x10] sm:$0xff] }
 0x22f   :  { %1921 = vmatpush.msra.mxu0 %v1874_v1  ;;  %2003 = vmatpush.msra.mxu2 %v1874_v1 }
 0x231   :  { %1922 = vmatpush.msra.mxu0 %v1873_v14  ;;  %2004 = vmatpush.msra.mxu2 %v1873_v14 }
 0x235   :  { %v1667_v26 = vpop.f32.mrf.mxu2 }
 0x236   :  { %v1668_v38 = vadd.f32 %v1667_v26, %v1645_v31  ;;  %v1896_v26 = vld [vmem:[%s4251_s5 + $0xc0] sm:$0xff] }
 0x23d   :  { %v1670_v11 = vpop.f32.mrf.mxu2 }
 0x24e   :  { %v1598_v19 = vpop.f32.mrf.mxu3 }
 0x24f   :  { %v4050_v62 = vadd.f32 %v1598_v19, %v1576_v60 }
 0x251   :  { %v4056_v3 = vmul.f32 0.70710677, %v4050_v62 }
 0x253   :  { %v1704_v8 = vmul.f32 %v4056_v3, %v4056_v3 }
 0x255   :  { %v4066_v12 = vmin.f32 %v1704_v8, 16.0  ;;  %v1671_v8 = vadd.f32 %v1670_v11, %v1648_v0 }
 0x256   :  { %v1601_v29 = vpop.f32.mrf.mxu3 }
 0x257   :  { %v1706_v63 = vmul.f32 2.1237322e-06, %v4066_v12  ;;  %v1717_v18 = vmul.f32 3.8918573e-05, %v4066_v12  ;;  %v4077_v20 = vadd.f32 %v1601_v29, %v1579_v16  ;;  %v1897_v16 = vld [vmem:[%s4251_s5 + $0xc8] sm:$0xff] }
 0x258   :  { %1937 = vmatpush.msra.mxu1 %v1897_v16  ;;  %2012 = vmatpush.msra.mxu3 %v1897_v16  ;;  %v1888_v16 = vld [vmem:[%s4251_s5 + $0x80] sm:$0xff] }
 0x259   :  { %v1707_v35 = vadd.f32 0.00028619796, %v1706_v63  ;;  %v1718_v22 = vadd.f32 0.001143296, %v1717_v18  ;;  %v4083_v2 = vmul.f32 0.70710677, %v4077_v20 }
 0x25a   :  { %1938 = vmatpush.msra.mxu1 %v1896_v26  ;;  %2013 = vmatpush.msra.mxu3 %v1896_v26 }
 0x25b   :  { %v1708_v24 = vmul.f32 %v1707_v35, %v4066_v12  ;;  %v1719_v59 = vmul.f32 %v1718_v22, %v4066_v12  ;;  %v1784_v33 = vmul.f32 %v4083_v2, %v4083_v2  ;;  %v1872_v35 = vld [vmem:[%s4251_s5] sm:$0xff] }
 0x25c   :  { %1923 = vmatpush.msra.mxu0 %v1872_v35  ;;  %2005 = vmatpush.msra.mxu2 %v1872_v35 }
 0x25d   :  { %v1709_v34 = vadd.f32 0.0036580483, %v1708_v24  ;;  %v1720_v50 = vadd.f32 0.014752088, %v1719_v59  ;;  %v4101_v39 = vmin.f32 %v1784_v33, 16.0  ;;  %v1895_v24 = vld [vmem:[%s4251_s5 + $0xb8] sm:$0xff] }
 0x25e   :  { %v1690_v40 = vpop.f32.mrf.mxu3  ;;  %1939 = vmatpush.msra.mxu1 %v1895_v24  ;;  %2014 = vmatpush.msra.mxu3 %v1895_v24 }
 0x25f   :  { %v1721_v44 = vmul.f32 %v1720_v50, %v4066_v12  ;;  %v1710_v43 = vmul.f32 %v1709_v34, %v4066_v12  ;;  %v1786_v32 = vmul.f32 2.1237322e-06, %v4101_v39  ;;  %v1797_v10 = vmul.f32 3.8918573e-05, %v4101_v39 }
 0x260   :  { %v4113_v46 = vadd.f32 %v1690_v40, %v1668_v38  ;;  %v1893_v40 = vld [vmem:[%s4251_s5 + $0xa8] sm:$0xff]  ;;  %1940 = vmatpush.msra.mxu1 %v1894_v36  ;;  %2015 = vmatpush.msra.mxu3 %v1894_v36 }
 0x261   :  { %v1722_v47 = vadd.f32 0.112945676, %v1721_v44  ;;  %v1787_v45 = vadd.f32 0.00028619796, %v1786_v32  ;;  %v1798_v52 = vadd.f32 0.001143296, %v1797_v10 }
 0x262   :  { %v4123_v56 = vmul.f32 0.70710677, %v4113_v46  ;;  %v1711_v58 = vadd.f32 0.05243302, %v1710_v43  ;;  %1941 = vmatpush.msra.mxu1 %v1893_v40  ;;  %2016 = vmatpush.msra.mxu3 %v1893_v40 }
 0x263   :  { %v1723_v53 = vmul.f32 %v1722_v47, %v4066_v12  ;;  %v1788_v60 = vmul.f32 %v1787_v45, %v4101_v39  ;;  %v1799_v21 = vmul.f32 %v1798_v52, %v4101_v39  ;;  %v1892_v47 = vld [vmem:[%s4251_s5 + $0xa0] sm:$0xff] }
 0x264   :  { %v1744_v25 = vmul.f32 %v4123_v56, %v4123_v56  ;;  %v1712_v63 = vmul.f32 %v1711_v58, %v4066_v12  ;;  %1942 = vmatpush.msra.mxu1 %v1892_v47  ;;  %2017 = vmatpush.msra.mxu3 %v1892_v47 }
 0x265   :  { %v1724_v19 = vadd.f32 0.4994258, %v1723_v53  ;;  %v1800_v7 = vadd.f32 0.014752088, %v1799_v21  ;;  %v1789_v61 = vadd.f32 0.0036580483, %v1788_v60 }
 0x266   :  { %v4142_v42 = vmin.f32 %v1744_v25, 16.0  ;;  %v1693_v5 = vpop.f32.mrf.mxu3  ;;  %v1713_v59 = vadd.f32 0.18741608, %v1712_v63  ;;  %v1890_v60 = vld [vmem:[%s4251_s5 + $0x90] sm:$0xff]  ;;  %1943 = vmatpush.msra.mxu1 %v1891_v6  ;;  %2018 = vmatpush.msra.mxu3 %v1891_v6 }
 0x267   :  { %v1725_v54 = vmul.f32 %v1724_v19, %v4066_v12  ;;  %v1801_v18 = vmul.f32 %v1800_v7, %v4101_v39  ;;  %v4155_v30 = vadd.f32 %v1693_v5, %v1671_v8  ;;  %v1790_v23 = vmul.f32 %v1789_v61, %v4101_v39 }
 0x268   :  { %v1746_v55 = vmul.f32 2.1237322e-06, %v4142_v42  ;;  %v1757_v9 = vmul.f32 3.8918573e-05, %v4142_v42  ;;  %v1714_v41 = vmul.f32 %v1713_v59, %v4066_v12  ;;  %1944 = vmatpush.msra.mxu1 %v1890_v60  ;;  %2019 = vmatpush.msra.mxu3 %v1890_v60  ;;  %v1698_v60 = vmul.f32 0.5, %v4077_v20 }
 0x269   :  { %v4152_v29 = vadd.f32 1.0, %v1725_v54  ;;  %v1802_v22 = vadd.f32 0.112945676, %v1801_v18  ;;  %v4171_v33 = vmul.f32 0.70710677, %v4155_v30 }
 0x26a   :  { %v1747_v28 = vadd.f32 0.00028619796, %v1746_v55  ;;  %v1758_v31 = vadd.f32 0.001143296, %v1757_v9  ;;  %v1791_v37 = vadd.f32 0.05243302, %v1790_v23  ;;  %1945 = vmatpush.msra.mxu1 %v1889_v4  ;;  %2020 = vmatpush.msra.mxu3 %v1889_v4 }
 0x26b   :  { %2042 = vrcp.f32 %v4152_v29  ;;  %v1803_v27 = vmul.f32 %v1802_v22, %v4101_v39  ;;  %v1824_v44 = vmul.f32 %v4171_v33, %v4171_v33  ;;  %v1715_v53 = vadd.f32 1.1283791, %v1714_v41 }
 0x26c   :  { %v1748_v50 = vmul.f32 %v1747_v28, %v4142_v42  ;;  %v1759_v38 = vmul.f32 %v1758_v31, %v4142_v42  ;;  %v1792_v12 = vmul.f32 %v1791_v37, %v4101_v39  ;;  %v1736_v13 = vand.u32 2147483647, %v4152_v29  ;;  %1946 = vmatpush.msra.mxu1 %v1888_v16  ;;  %2021 = vmatpush.msra.mxu3 %v1888_v16 }
 0x26d   :  { %v1804_v34 = vadd.f32 0.4994258, %v1803_v27  ;;  %v4185_v10 = vmin.f32 %v1824_v44, 16.0  ;;  %v1738_v11 = vand.u32 2147483648, %v4152_v29  ;;  %vm1732_vm1 = vweird.f32 %v4152_v29 }
 0x26e   :  { %v1749_v43 = vadd.f32 0.0036580483, %v1748_v50  ;;  %v1760_v32 = vadd.f32 0.014752088, %v1759_v38  ;;  %v1793_v1 = vadd.f32 0.18741608, %v1792_v12  ;;  %v1716_v5 = vmul.f32 %v1715_v53, %v4056_v3 }
 0x26f   :  { %v1805_v49 = vmul.f32 %v1804_v34, %v4101_v39  ;;  %v1826_v45 = vmul.f32 2.1237322e-06, %v4185_v10  ;;  %v1837_v52 = vmul.f32 3.8918573e-05, %v4185_v10  ;;  %vm1737_vm3 = vcmp.eq.f32.partialorder %v1736_v13, 8.507059e+37 }
 0x270   :  { %v1761_v51 = vmul.f32 %v1760_v32, %v4142_v42  ;;  %v1750_v58 = vmul.f32 %v1749_v43, %v4142_v42  ;;  %v1739_v14 = vor.u32 1.1754944e-38, %v1738_v11  ;;  %v1794_v9 = vmul.f32 %v1793_v1, %v4101_v39 }
 0x271   :  { %v2043_v17 = vpop.eup %2042  ;;  %v4191_v15 = vadd.f32 1.0, %v1805_v49  ;;  %v1827_v19 = vadd.f32 0.00028619796, %v1826_v45  ;;  %v1838_v25 = vadd.f32 0.001143296, %v1837_v52  ;;  %v1696_v44 = vmul.f32 0.5, %v4050_v62 }
 0x272   :  { %v1728_v48 = vmul.f32 %v2043_v17, %v4152_v29  ;;  %vm1733_vm0 = vweird.f32 %v2043_v17  ;;  %v1762_v0 = vadd.f32 0.112945676, %v1761_v51  ;;  %v1751_v29 = vadd.f32 0.05243302, %v1750_v58 }
 0x273   :  { %2044 = vrcp.f32 %v4191_v15  ;;  %v1828_v54 = vmul.f32 %v1827_v19, %v4185_v10  ;;  %v1839_v61 = vmul.f32 %v1838_v25, %v4185_v10  ;;  %vm1734_vm2 = vmor %vm1732_vm1, %vm1733_vm0  ;;  %v1818_v28 = vand.u32 2147483648, %v4191_v15 }
 0x274   :  { %v1729_v57 = vsub.f32 1.0, %v1728_v48  ;;  %v1763_v8 = vmul.f32 %v1762_v0, %v4142_v42  ;;  %v1752_v34 = vmul.f32 %v1751_v29, %v4142_v42  ;;  %v1795_v39 = vadd.f32 1.1283791, %v1794_v9 }
 0x275   :  { %v1840_v35 = vadd.f32 0.014752088, %v1839_v61  ;;  %v1829_v24 = vadd.f32 0.0036580483, %v1828_v54  ;;  %v1816_v38 = vand.u32 2147483647, %v4191_v15  ;;  %vm1812_vm5 = vweird.f32 %v4191_v15 }
 0x276   :  { %v1730_v21 = vmul.f32 %v2043_v17, %v1729_v57  ;;  %v1764_v55 = vadd.f32 0.4994258, %v1763_v8  ;;  %v1819_v32 = vor.u32 1.1754944e-38, %v1818_v28  ;;  %v1753_v47 = vadd.f32 0.18741608, %v1752_v34 }
 0x277   :  { %v1841_v59 = vmul.f32 %v1840_v35, %v4185_v10  ;;  %v1830_v41 = vmul.f32 %v1829_v24, %v4185_v10  ;;  %v1796_v48 = vmul.f32 %v1795_v39, %v4083_v2  ;;  %vm1817_vm7 = vcmp.eq.f32.partialorder %v1816_v38, 8.507059e+37 }
 0x278   :  { %v1731_v7 = vadd.f32 %v2043_v17, %v1730_v21  ;;  %v1765_v26 = vmul.f32 %v1764_v55, %v4142_v42  ;;  %v1697_v55 = vmul.f32 0.5, %v4113_v46  ;;  %v1699_v46 = vmul.f32 0.5, %v4155_v30 }
 0x279   :  { %v2045_v63 = vpop.eup %2044  ;;  %v1842_v36 = vadd.f32 0.112945676, %v1841_v59  ;;  %v1831_v62 = vadd.f32 0.05243302, %v1830_v41 }
 0x27a   :  { %v1735_v18 = vsel %vm1734_vm2, %v2043_v17, %v1731_v7  ;;  %v1808_v3 = vmul.f32 %v2045_v63, %v4191_v15  ;;  %v1766_v50 = vadd.f32 1.0, %v1765_v26  ;;  %vm1813_vm4 = vweird.f32 %v2045_v63 }
 0x27b   :  { %v1740_v22 = vsel %vm1737_vm3, %v1739_v14, %v1735_v18  ;;  %v1843_v17 = vmul.f32 %v1842_v36, %v4185_v10  ;;  %vm1814_vm6 = vmor %vm1812_vm5, %vm1813_vm4  ;;  %v1754_v15 = vmul.f32 %v1753_v47, %v4142_v42  ;;  %v1832_v11 = vmul.f32 %v1831_v62, %v4185_v10  ;;  %v2025_v36 = vld [vmem:[%s4252_s6] ss:$0 sm:$0xff]  ;;  %s2091_s6 = smov 8  }
 0x27c   :  { %v1741_v23 = vmul.f32 %v1740_v22, %v1716_v5  ;;  %v1809_v27 = vsub.f32 1.0, %v1808_v3  ;;  %2046 = vrcp.f32 %v1766_v50  ;;  %v1778_v19 = vand.u32 2147483648, %v1766_v50 }
 0x27d   :  { %v1844_v51 = vadd.f32 0.4994258, %v1843_v17  ;;  %v1755_v0 = vadd.f32 1.1283791, %v1754_v15  ;;  %v1776_v4 = vand.u32 2147483647, %v1766_v50  ;;  %vm1772_vm9 = vweird.f32 %v1766_v50 }
 0x27e   :  { %v1986_v31 = vclamps-f32 %v1741_v23, 1.0  ;;  %v1810_v37 = vmul.f32 %v2045_v63, %v1809_v27  ;;  %v1833_v7 = vadd.f32 0.18741608, %v1832_v11  ;;  %v1779_v42 = vor.u32 1.1754944e-38, %v1778_v19 }
 0x27f   :  { %v1845_v6 = vmul.f32 %v1844_v51, %v4185_v10  ;;  %v1756_v54 = vmul.f32 %v1755_v0, %v4123_v56  ;;  %vm1777_vm11 = vcmp.eq.f32.partialorder %v1776_v4, 8.507059e+37 }
 0x280   :  { %v1864_v40 = vadd.f32 1.0, %v1986_v31  ;;  %v1811_v49 = vadd.f32 %v2045_v63, %v1810_v37  ;;  %v1834_v14 = vmul.f32 %v1833_v7, %v4185_v10 }
 0x281   :  { %v1846_v58 = vadd.f32 1.0, %v1845_v6 }
 0x282   :  { %v1868_v43 = vmul.f32 %v1864_v40, %v1696_v44  ;;  %v1815_v12 = vsel %vm1814_vm6, %v2045_v63, %v1811_v49  ;;  %v2047_v53 = vpop.eup %2046  ;;  %v1835_v35 = vadd.f32 1.1283791, %v1834_v14 }
 0x283   :  { %v1820_v45 = vsel %vm1817_vm7, %v1819_v32, %v1815_v12  ;;  %v1768_v13 = vmul.f32 %v2047_v53, %v1766_v50  ;;  %2048 = vrcp.f32 %v1846_v58  ;;  %vm1773_vm8 = vweird.f32 %v2047_v53 }
 0x284   :  { %1924 = vmatmul.f32.vlgmr.msra.gmra.mxu0 %v1868_v43  ;;  %v1821_v52 = vmul.f32 %v1820_v45, %v1796_v48  ;;  %vm1774_vm10 = vmor %vm1772_vm9, %vm1773_vm8  ;;  %v1858_v22 = vand.u32 2147483648, %v1846_v58  ;;  %v1856_v23 = vand.u32 2147483647, %v1846_v58  ;;  %vm1852_vm13 = vweird.f32 %v1846_v58 }
 0x285   :  { %v1769_v21 = vsub.f32 1.0, %v1768_v13  ;;  %v1836_v59 = vmul.f32 %v1835_v35, %v4171_v33 }
 0x286   :  { %v1988_v57 = vclamps-f32 %v1821_v52, 1.0  ;;  %v1859_v24 = vor.u32 1.1754944e-38, %v1858_v22  ;;  %vm1857_vm15 = vcmp.eq.f32.partialorder %v1856_v23, 8.507059e+37 }
 0x287   :  { %v1770_v1 = vmul.f32 %v2047_v53, %v1769_v21 }
 0x288   :  { %v1866_v2 = vadd.f32 1.0, %v1988_v57 }
 0x289   :  { %v1771_v8 = vadd.f32 %v2047_v53, %v1770_v1  ;;  %v2049_v20 = vpop.eup %2048 }
 0x28a   :  { %v1870_v25 = vmul.f32 %v1866_v2, %v1698_v60  ;;  %v1848_v63 = vmul.f32 %v2049_v20, %v1846_v58  ;;  %vm1853_vm12 = vweird.f32 %v2049_v20 }
 0x28b   :  { %v1775_v61 = vsel %vm1774_vm10, %v2047_v53, %v1771_v8  ;;  %vm1854_vm14 = vmor %vm1852_vm13, %vm1853_vm12 }
 0x28c   :  { %1927 = vmatmul.f32.vlgmr.msra.gmra.mxu2 %v1870_v25  ;;  %v1780_v5 = vsel %vm1777_vm11, %v1779_v42, %v1775_v61  ;;  %v1849_v29 = vsub.f32 1.0, %v1848_v63 }
 0x28d   :  { %v1781_v16 = vmul.f32 %v1780_v5, %v1756_v54 }
 0x28e   :  { %v1850_v3 = vmul.f32 %v2049_v20, %v1849_v29 }
 0x28f   :  { %v1987_v18 = vclamps-f32 %v1781_v16, 1.0 }
 0x290   :  { %v1851_v56 = vadd.f32 %v2049_v20, %v1850_v3 }
 0x291   :  { %v1865_v9 = vadd.f32 1.0, %v1987_v18 }
 0x292   :  { %v1855_v10 = vsel %vm1854_vm14, %v2049_v20, %v1851_v56 }
 0x293   :  { %v1869_v26 = vmul.f32 %v1865_v9, %v1697_v55  ;;  %v1860_v27 = vsel %vm1857_vm15, %v1859_v24, %v1855_v10 }
 0x294   :  { %v1861_v28 = vmul.f32 %v1860_v27, %v1836_v59 }
 0x295   :  { %1947 = vmatmul.f32.vlgmr.msra.gmra.mxu1 %v1869_v26 }
 0x296   :  { %v1989_v31 = vclamps-f32 %v1861_v28, 1.0 }
 0x298   :  { %v1867_v34 = vadd.f32 1.0, %v1989_v31 }
 0x29a   :  { %v1871_v50 = vmul.f32 %v1867_v34, %v1699_v46 }
 0x29c   :  { %1950 = vmatmul.f32.vlgmr.msra.gmra.mxu3 %v1871_v50 }
 0x301   :  { %v1925_v39 = vpop.f32.mrf.mxu0 }
 0x302   :  { %v1926_v37 = vadd.f32 %v2025_v36, %v1925_v39 }
 0x30f   :  { %v1928_v33 = vpop.f32.mrf.mxu2 }
 0x310   :  { %v1929_v30 = vadd.f32 %v2025_v36, %v1928_v33 }
 0x312   :  { %v1948_v38 = vpop.f32.mrf.mxu1 }
 0x313   :  { %v1949_v44 = vadd.f32 %v1948_v38, %v1926_v37 }
 0x315   :  { %1954 = vst [vmem:[#allocation3] sm:$0xff] %v1949_v44 }
 0x31f   :  { %v1951_v40 = vpop.f32.mrf.mxu3 }
 0x320   :  { %v1952_v41 = vadd.f32 %v1951_v40, %v1929_v30 }
 0x322   :  { %1955 = vst [vmem:[#allocation3 + $0x8] sm:$0xff] %v1952_v41 }
 0x323   :  { %1968 = dma.vmem_to_hbm [thread:$0]  %s1961_s0, 256, %s1963_s28, [#allocation4], %s2090_s29, %s2090_s29, %s2091_s6  }
 0x324   :  { %2087 = dma.done.wait [#allocation4], 256  }
 0x325   :  { %2088 = vsyncadd [#allocation4], 4294967040 }
 0x326   :  { %1973 = vsyncpa [#allocation4], 1 }

</bundles_post_ra>
